<compile_context>
chip_gen: v7x
topology: tpu7x:2x2x1
jax: 0.10.0
libtpu: 0.0.40
codegen_flags: <defaults>
</compile_context>

<pallas_src>
import functools

import jax
import jax.numpy as jnp
from jax.experimental import pallas as pl
from jax.experimental.pallas import tpu as pltpu

_LANE = 128                      # lane-axis tiling unit (last dim)
_SUBLANE = 8                     # f32 sublane tiling unit (second-to-last dim)
_VMEM_BUDGET = 48 * 1024 * 1024  # leave headroom inside v7x's 64 MiB VMEM


def _round_up(x, m):
    return (x + m - 1) // m * m


def _maybe_pad(a, pads):
    """jnp.pad, skipped when all pads are zero (avoids a gratuitous copy)."""
    if all(p == 0 for _, p in pads):
        return a
    return jnp.pad(a, pads)


def _mlp_encoder_kernel(x_ref, w1_ref, b1_ref, w2_ref, b2_ref, o_ref):
    """out = relu(x @ W1 + b1) @ W2 + b2 for one (tb, D) batch tile."""
    x = x_ref[...]
    # Layer 1 on the MXU with f32 accumulation.
    h = jnp.dot(x, w1_ref[...], preferred_element_type=jnp.float32)
    # Bias + ReLU on the VPU, kept in f32 (fast path on v5e, fine everywhere).
    h = jnp.maximum(h + b1_ref[...].astype(jnp.float32), 0.0)
    # Layer 2: cast only at the MXU input; bias add stays on the f32 accumulator.
    out = jnp.dot(h.astype(w2_ref.dtype), w2_ref[...],
                  preferred_element_type=jnp.float32)
    out = out + b2_ref[...].astype(jnp.float32)
    o_ref[...] = out.astype(o_ref.dtype)


def _pick_batch_tile(requested, b_padded, d_p, h_p, e_p, in_itemsize, out_itemsize):
    """Largest multiple-of-8 batch tile <= requested that fits the VMEM budget."""
    # Weights/biases are DMA'd once (constant index_map) but the pipeline still
    # reserves two buffers for them; budget 2x.
    weight_bytes = 2 * (d_p * h_p + h_p * e_p + h_p + e_p) * in_itemsize
    # Per-batch-row footprint: double-buffered x and out tiles + f32 intermediates.
    per_row = 2 * (d_p * in_itemsize + e_p * out_itemsize) + (h_p + e_p) * 4
    avail = max(_VMEM_BUDGET - weight_bytes, _SUBLANE * per_row)
    max_rows = max(_SUBLANE, (avail // per_row) // _SUBLANE * _SUBLANE)
    tb = min(requested, b_padded, max_rows)
    return max(_SUBLANE, (tb // _SUBLANE) * _SUBLANE)


def mlp_encoder(x, w1, b1, w2, b2, *, batch_tile=None, out_dtype=None):
    """2-layer MLP encoder as one pallas_call, tiled over the batch axis.

    x: [B, D_in]; w1: [D_in, H]; b1: [H] or [1, H]; w2: [H, E]; b2: [E] or [1, E].
    Weights are pre-transposed ([in, out]) so the kernel computes x @ W directly.
    """
    B, D_in = x.shape
    H = w1.shape[1]
    E = w2.shape[1]
    assert w1.shape[0] == D_in and w2.shape[0] == H
    b1 = b1.reshape(1, H)
    b2 = b2.reshape(1, E)
    out_dtype = out_dtype or x.dtype
    requested_tb = batch_tile or 512

    # Lane-dense padding: feature dims -> multiples of 128, batch -> multiple of 8.
    Dp = _round_up(D_in, _LANE)
    Hp = _round_up(H, _LANE)
    Ep = _round_up(E, _LANE)
    Bp = _round_up(B, _SUBLANE)

    in_itemsize = jnp.dtype(x.dtype).itemsize
    out_itemsize = jnp.dtype(out_dtype).itemsize
    tb = _pick_batch_tile(requested_tb, Bp, Dp, Hp, Ep, in_itemsize, out_itemsize)
    Bp = _round_up(Bp, tb)

    xp = _maybe_pad(x, ((0, Bp - B), (0, Dp - D_in)))
    w1p = _maybe_pad(w1, ((0, Dp - D_in), (0, Hp - H)))
    b1p = _maybe_pad(b1, ((0, 0), (0, Hp - H)))
    w2p = _maybe_pad(w2, ((0, Hp - H), (0, Ep - E)))
    b2p = _maybe_pad(b2, ((0, 0), (0, Ep - E)))

    grid = (Bp // tb,)

    flops = 2 * Bp * (Dp * Hp + Hp * Ep)
    bytes_accessed = (xp.size * in_itemsize
                      + (w1p.size + b1p.size + w2p.size + b2p.size) * in_itemsize
                      + Bp * Ep * out_itemsize)
    cost = pl.CostEstimate(flops=flops, transcendentals=0,
                           bytes_accessed=bytes_accessed)

    # Explicit VMEM budget (weights double-buffered + streamed tiles + f32 scratch).
    weight_resident = 2 * (w1p.size + b1p.size + w2p.size + b2p.size) * in_itemsize
    tile_bytes = 2 * (tb * Dp * in_itemsize + tb * Ep * out_itemsize)
    scratch_bytes = tb * (Hp + Ep) * 4
    vmem_limit = min(
        max(int(1.5 * (weight_resident + tile_bytes + scratch_bytes)) + (4 << 20),
            32 << 20),
        64 << 20)

    out_padded = pl.pallas_call(
        _mlp_encoder_kernel,
        out_shape=jax.ShapeDtypeStruct((Bp, Ep), out_dtype),
        grid_spec=pltpu.PrefetchScalarGridSpec(
            num_scalar_prefetch=0,
            grid=grid,
            in_specs=[
                pl.BlockSpec((tb, Dp), lambda i: (i, 0)),   # x tile (streamed)
                pl.BlockSpec((Dp, Hp), lambda i: (0, 0)),   # W1 (resident)
                pl.BlockSpec((1, Hp), lambda i: (0, 0)),    # b1
                pl.BlockSpec((Hp, Ep), lambda i: (0, 0)),   # W2 (resident)
                pl.BlockSpec((1, Ep), lambda i: (0, 0)),    # b2
            ],
            out_specs=pl.BlockSpec((tb, Ep), lambda i: (i, 0)),
        ),
        compiler_params=pltpu.CompilerParams(
            dimension_semantics=("parallel",),
            vmem_limit_bytes=int(vmem_limit),
        ),
        cost_estimate=cost,
    )(xp, w1p, b1p, w2p, b2p)

    if Bp == B and Ep == E:
        return out_padded
    return out_padded[:B, :E]


def init_tower_params(key, d_in, d_hidden, d_out, dtype=jnp.float32):
    """Shapes mirror nn.Linear(d_in, d_hidden) -> nn.Linear(d_hidden, d_out),
    with weights pre-transposed to [in, out]."""
    k1, k2, k3, k4 = jax.random.split(key, 4)
    w1 = jax.random.normal(k1, (d_in, d_hidden), dtype) * (1.0 / jnp.sqrt(d_in))
    b1 = jax.random.normal(k2, (1, d_hidden), dtype) * 0.01
    w2 = jax.random.normal(k3, (d_hidden, d_out), dtype) * (1.0 / jnp.sqrt(d_hidden))
    b2 = jax.random.normal(k4, (1, d_out), dtype) * 0.01
    return w1, b1, w2, b2


def two_tower_forward(query, doc, query_params, doc_params, *, batch_tile=None):
    """Mirror of TwoTowerModel.forward: returns (h_queries, h_docs).

    The two towers are independent pallas_calls; with a multi-step "parallel" batch
    grid each call also shards across both TensorCores on v7x."""
    h_queries = mlp_encoder(query, *query_params, batch_tile=batch_tile)
    h_docs = mlp_encoder(doc, *doc_params, batch_tile=batch_tile)
    return h_queries, h_docs


def _reference_mlp(x, w1, b1, w2, b2):
    hi = jax.lax.Precision.HIGHEST
    h = jnp.maximum(jnp.dot(x, w1, precision=hi) + b1.reshape(1, -1), 0.0)
    return jnp.dot(h, w2, precision=hi) + b2.reshape(1, -1)


if __name__ == "__main__":
    key = jax.random.PRNGKey(0)
    kq, kd, kx, ky = jax.random.split(key, 4)

    # Small but lane-dense shapes: batch=256, query dim=128, doc dim=256,
    # hidden=256, embedding=128.  batch_tile=128 gives a 2-step pipelined,
    # megacore-parallel batch grid.
    B, DQ, DD, H, E = 256, 128, 256, 256, 128

    query = jax.random.normal(kx, (B, DQ), jnp.float32)
    doc = jax.random.normal(ky, (B, DD), jnp.float32)

    query_params = init_tower_params(kq, DQ, H, E)
    doc_params = init_tower_params(kd, DD, H, E)

    fwd = jax.jit(functools.partial(two_tower_forward, batch_tile=128))
    h_q, h_d = fwd(query, doc, query_params, doc_params)
    jax.block_until_ready((h_q, h_d))

    # Correctness vs plain-JAX f32 reference.
    ref_q = _reference_mlp(query, *query_params)
    ref_d = _reference_mlp(doc, *doc_params)
    assert h_q.shape == (B, E) and h_d.shape == (B, E)
    assert jnp.allclose(h_q, ref_q, atol=1e-3, rtol=1e-3)
    assert jnp.allclose(h_d, ref_d, atol=1e-3, rtol=1e-3)

    # Mixed-precision path: bf16 activations/weights, f32 accumulate + f32 VPU work.
    to_bf16 = lambda t: jax.tree_util.tree_map(lambda a: a.astype(jnp.bfloat16), t)
    h_qb, h_db = fwd(to_bf16(query), to_bf16(doc),
                     to_bf16(query_params), to_bf16(doc_params))
    jax.block_until_ready((h_qb, h_db))
    assert h_qb.shape == (B, E) and h_db.shape == (B, E)
    assert jnp.allclose(h_qb.astype(jnp.float32), ref_q, atol=7e-2, rtol=7e-2)

    # Non-aligned shapes exercise the padding path (D=100, H=200, E=96, B=50).
    ks1, ks2 = jax.random.split(key)
    q_small = jax.random.normal(ks1, (50, 100), jnp.float32)
    p_small = init_tower_params(ks2, 100, 200, 96)
    h_small = mlp_encoder(q_small, *p_small)
    jax.block_until_ready(h_small)
    assert h_small.shape == (50, 96)
    assert jnp.allclose(h_small, _reference_mlp(q_small, *p_small),
                        atol=1e-3, rtol=1e-3)

    print("KERNEL_OK")
</pallas_src>

<mosaic_0001>
module attributes {stable_mosaic.version = 11 : i64} {
  func.func @_mlp_encoder_kernel(%arg0: i32, %arg1: memref<128x128xf32, #tpu.memory_space<vmem>>, %arg2: memref<128x256xf32, #tpu.memory_space<vmem>>, %arg3: memref<1x256xf32, #tpu.memory_space<vmem>>, %arg4: memref<256x128xf32, #tpu.memory_space<vmem>>, %arg5: memref<1x128xf32, #tpu.memory_space<vmem>>, %arg6: memref<128x128xf32, #tpu.memory_space<vmem>>) attributes {dimension_semantics = [#tpu.dimension_semantics<parallel>], iteration_bounds = array<i64: 2>, scalar_prefetch = 0 : i64, scratch_operands = 0 : i64, tpu.core_type = #tpu.core_type<tc>, window_params = [{transform_indices = @transform_0, window_bounds = array<i64: 128, 128>}, {pipeline_mode = #tpu.pipeline_mode<synchronous>, transform_indices = @transform_1, window_bounds = array<i64: 128, 256>}, {pipeline_mode = #tpu.pipeline_mode<synchronous>, transform_indices = @transform_2, window_bounds = array<i64: 1, 256>}, {pipeline_mode = #tpu.pipeline_mode<synchronous>, transform_indices = @transform_3, window_bounds = array<i64: 256, 128>}, {pipeline_mode = #tpu.pipeline_mode<synchronous>, transform_indices = @transform_4, window_bounds = array<i64: 1, 128>}, {transform_indices = @transform_5, window_bounds = array<i64: 128, 128>}]} {
    %c0 = arith.constant 0 : index
    %c0_0 = arith.constant 0 : index
    %0 = vector.load %arg1[%c0, %c0_0] : memref<128x128xf32, #tpu.memory_space<vmem>>, vector<128x128xf32>
    %c0_1 = arith.constant 0 : index
    %c0_2 = arith.constant 0 : index
    %1 = vector.load %arg2[%c0_1, %c0_2] : memref<128x256xf32, #tpu.memory_space<vmem>>, vector<128x256xf32>
    %cst = arith.constant dense<0.000000e+00> : vector<128x256xf32>
    %2 = tpu.matmul %0, %1, %cst {dimension_numbers = #tpu.dot_dimension_numbers<[1], [0], [0], [1], [0, 0, 1, 1], [], []>} : vector<128x128xf32>, vector<128x256xf32>, vector<128x256xf32> -> vector<128x256xf32>
    %c0_3 = arith.constant 0 : index
    %c0_4 = arith.constant 0 : index
    %3 = vector.load %arg3[%c0_3, %c0_4] : memref<1x256xf32, #tpu.memory_space<vmem>>, vector<1x256xf32>
    %4 = vector.broadcast %3 : vector<1x256xf32> to vector<128x256xf32>
    %5 = arith.addf %2, %4 : vector<128x256xf32>
    %cst_5 = arith.constant 0.000000e+00 : f32
    %6 = vector.broadcast %cst_5 : f32 to vector<128x256xf32>
    %7 = arith.maximumf %5, %6 : vector<128x256xf32>
    %c0_6 = arith.constant 0 : index
    %c0_7 = arith.constant 0 : index
    %8 = vector.load %arg4[%c0_6, %c0_7] : memref<256x128xf32, #tpu.memory_space<vmem>>, vector<256x128xf32>
    %cst_8 = arith.constant dense<0.000000e+00> : vector<128x128xf32>
    %9 = tpu.matmul %7, %8, %cst_8 {dimension_numbers = #tpu.dot_dimension_numbers<[1], [0], [0], [1], [0, 0, 1, 1], [], []>} : vector<128x256xf32>, vector<256x128xf32>, vector<128x128xf32> -> vector<128x128xf32>
    %c0_9 = arith.constant 0 : index
    %c0_10 = arith.constant 0 : index
    %10 = vector.load %arg5[%c0_9, %c0_10] : memref<1x128xf32, #tpu.memory_space<vmem>>, vector<1x128xf32>
    %11 = vector.broadcast %10 : vector<1x128xf32> to vector<128x128xf32>
    %12 = arith.addf %9, %11 : vector<128x128xf32>
    %c0_11 = arith.constant 0 : index
    %c0_12 = arith.constant 0 : index
    %13 = vector.load %arg6[%c0_11, %c0_12] : memref<128x128xf32, #tpu.memory_space<vmem>>, vector<128x128xf32>
    tpu.vector_store %arg6[%c0_11, %c0_12], %12 {strides = array<i32>} : memref<128x128xf32, #tpu.memory_space<vmem>>, vector<128x128xf32>,
    return
  }
  func.func @transform_0(%arg0: i32) -> (i32, i32) {
    %c0_i32 = arith.constant 0 : i32
    %c0_i32_0 = arith.constant 0 : i32
    return %arg0, %c0_i32 : i32, i32
  }
  func.func @transform_1(%arg0: i32) -> (i32, i32) {
    %c0_i32 = arith.constant 0 : i32
    %c0_i32_0 = arith.constant 0 : i32
    %c0_i32_1 = arith.constant 0 : i32
    return %c0_i32, %c0_i32_0 : i32, i32
  }
  func.func @transform_2(%arg0: i32) -> (i32, i32) {
    %c0_i32 = arith.constant 0 : i32
    %c0_i32_0 = arith.constant 0 : i32
    %c0_i32_1 = arith.constant 0 : i32
    return %c0_i32, %c0_i32_0 : i32, i32
  }
  func.func @transform_3(%arg0: i32) -> (i32, i32) {
    %c0_i32 = arith.constant 0 : i32
    %c0_i32_0 = arith.constant 0 : i32
    %c0_i32_1 = arith.constant 0 : i32
    return %c0_i32, %c0_i32_0 : i32, i32
  }
  func.func @transform_4(%arg0: i32) -> (i32, i32) {
    %c0_i32 = arith.constant 0 : i32
    %c0_i32_0 = arith.constant 0 : i32
    %c0_i32_1 = arith.constant 0 : i32
    return %c0_i32, %c0_i32_0 : i32, i32
  }
  func.func @transform_5(%arg0: i32) -> (i32, i32) {
    %c0_i32 = arith.constant 0 : i32
    %c0_i32_0 = arith.constant 0 : i32
    return %arg0, %c0_i32 : i32, i32
  }
}

module attributes {stable_mosaic.version = 11 : i64} {
  func.func @_mlp_encoder_kernel(%arg0: i32, %arg1: memref<128x256xf32, #tpu.memory_space<vmem>>, %arg2: memref<256x256xf32, #tpu.memory_space<vmem>>, %arg3: memref<1x256xf32, #tpu.memory_space<vmem>>, %arg4: memref<256x128xf32, #tpu.memory_space<vmem>>, %arg5: memref<1x128xf32, #tpu.memory_space<vmem>>, %arg6: memref<128x128xf32, #tpu.memory_space<vmem>>) attributes {dimension_semantics = [#tpu.dimension_semantics<parallel>], iteration_bounds = array<i64: 2>, scalar_prefetch = 0 : i64, scratch_operands = 0 : i64, tpu.core_type = #tpu.core_type<tc>, window_params = [{transform_indices = @transform_0, window_bounds = array<i64: 128, 256>}, {pipeline_mode = #tpu.pipeline_mode<synchronous>, transform_indices = @transform_1, window_bounds = array<i64: 256, 256>}, {pipeline_mode = #tpu.pipeline_mode<synchronous>, transform_indices = @transform_2, window_bounds = array<i64: 1, 256>}, {pipeline_mode = #tpu.pipeline_mode<synchronous>, transform_indices = @transform_3, window_bounds = array<i64: 256, 128>}, {pipeline_mode = #tpu.pipeline_mode<synchronous>, transform_indices = @transform_4, window_bounds = array<i64: 1, 128>}, {transform_indices = @transform_5, window_bounds = array<i64: 128, 128>}]} {
    %c0 = arith.constant 0 : index
    %c0_0 = arith.constant 0 : index
    %0 = vector.load %arg1[%c0, %c0_0] : memref<128x256xf32, #tpu.memory_space<vmem>>, vector<128x256xf32>
    %c0_1 = arith.constant 0 : index
    %c0_2 = arith.constant 0 : index
    %1 = vector.load %arg2[%c0_1, %c0_2] : memref<256x256xf32, #tpu.memory_space<vmem>>, vector<256x256xf32>
    %cst = arith.constant dense<0.000000e+00> : vector<128x256xf32>
    %2 = tpu.matmul %0, %1, %cst {dimension_numbers = #tpu.dot_dimension_numbers<[1], [0], [0], [1], [0, 0, 1, 1], [], []>} : vector<128x256xf32>, vector<256x256xf32>, vector<128x256xf32> -> vector<128x256xf32>
    %c0_3 = arith.constant 0 : index
    %c0_4 = arith.constant 0 : index
    %3 = vector.load %arg3[%c0_3, %c0_4] : memref<1x256xf32, #tpu.memory_space<vmem>>, vector<1x256xf32>
    %4 = vector.broadcast %3 : vector<1x256xf32> to vector<128x256xf32>
    %5 = arith.addf %2, %4 : vector<128x256xf32>
    %cst_5 = arith.constant 0.000000e+00 : f32
    %6 = vector.broadcast %cst_5 : f32 to vector<128x256xf32>
    %7 = arith.maximumf %5, %6 : vector<128x256xf32>
    %c0_6 = arith.constant 0 : index
    %c0_7 = arith.constant 0 : index
    %8 = vector.load %arg4[%c0_6, %c0_7] : memref<256x128xf32, #tpu.memory_space<vmem>>, vector<256x128xf32>
    %cst_8 = arith.constant dense<0.000000e+00> : vector<128x128xf32>
    %9 = tpu.matmul %7, %8, %cst_8 {dimension_numbers = #tpu.dot_dimension_numbers<[1], [0], [0], [1], [0, 0, 1, 1], [], []>} : vector<128x256xf32>, vector<256x128xf32>, vector<128x128xf32> -> vector<128x128xf32>
    %c0_9 = arith.constant 0 : index
    %c0_10 = arith.constant 0 : index
    %10 = vector.load %arg5[%c0_9, %c0_10] : memref<1x128xf32, #tpu.memory_space<vmem>>, vector<1x128xf32>
    %11 = vector.broadcast %10 : vector<1x128xf32> to vector<128x128xf32>
    %12 = arith.addf %9, %11 : vector<128x128xf32>
    %c0_11 = arith.constant 0 : index
    %c0_12 = arith.constant 0 : index
    %13 = vector.load %arg6[%c0_11, %c0_12] : memref<128x128xf32, #tpu.memory_space<vmem>>, vector<128x128xf32>
    tpu.vector_store %arg6[%c0_11, %c0_12], %12 {strides = array<i32>} : memref<128x128xf32, #tpu.memory_space<vmem>>, vector<128x128xf32>,
    return
  }
  func.func @transform_0(%arg0: i32) -> (i32, i32) {
    %c0_i32 = arith.constant 0 : i32
    %c0_i32_0 = arith.constant 0 : i32
    return %arg0, %c0_i32 : i32, i32
  }
  func.func @transform_1(%arg0: i32) -> (i32, i32) {
    %c0_i32 = arith.constant 0 : i32
    %c0_i32_0 = arith.constant 0 : i32
    %c0_i32_1 = arith.constant 0 : i32
    return %c0_i32, %c0_i32_0 : i32, i32
  }
  func.func @transform_2(%arg0: i32) -> (i32, i32) {
    %c0_i32 = arith.constant 0 : i32
    %c0_i32_0 = arith.constant 0 : i32
    %c0_i32_1 = arith.constant 0 : i32
    return %c0_i32, %c0_i32_0 : i32, i32
  }
  func.func @transform_3(%arg0: i32) -> (i32, i32) {
    %c0_i32 = arith.constant 0 : i32
    %c0_i32_0 = arith.constant 0 : i32
    %c0_i32_1 = arith.constant 0 : i32
    return %c0_i32, %c0_i32_0 : i32, i32
  }
  func.func @transform_4(%arg0: i32) -> (i32, i32) {
    %c0_i32 = arith.constant 0 : i32
    %c0_i32_0 = arith.constant 0 : i32
    %c0_i32_1 = arith.constant 0 : i32
    return %c0_i32, %c0_i32_0 : i32, i32
  }
  func.func @transform_5(%arg0: i32) -> (i32, i32) {
    %c0_i32 = arith.constant 0 : i32
    %c0_i32_0 = arith.constant 0 : i32
    return %arg0, %c0_i32 : i32, i32
  }
}

</mosaic_0001>

<bundles_post_ra>
// kernel: two_tower_forward.3
= control target key start
LH: loop header
LB: loop body
LE: loop exit
PB: predicated region body
PF: predicated region fallthrough
CT: control target
= control target key end

     0   :  { %10 = vsyncpa [#allocation3], 0  ;;  %s1659_s0 = inlined_call_operand.vmem [shape: f32[256,256], index: 0, kind: input, shape index: {}]   ;;  %s1660_s1 = inlined_call_operand.vmem [shape: f32[256,256], index: 1, kind: input, shape index: {}]   ;;  %s1661_s2 = inlined_call_operand.vmem [shape: f32[1,256], index: 2, kind: input, shape index: {}]   ;;  %s1662_s3 = inlined_call_operand.hbm [shape: f32[256,128], index: 3, kind: input, shape index: {}]   ;;  %s1663_s4 = inlined_call_operand.vmem [shape: f32[1,128], index: 4, kind: input, shape index: {}]   ;;  %s1664_s5 = inlined_call_operand.hbm [shape: f32[256,128], index: 5, kind: output, shape index: {}]  }
   0x1   :  { %11 = vsyncpa [#allocation4], 0 }
   0x2   :  { %13 = vsyncpa [#allocation4 + $0x1], 0  ;;  %s1213_s18 = smov 0   ;;  %s1215_s19 = smov 0  }
   0x3   :  { %s1217_s20 = smov 0   ;;  %s1219_s21 = smov 0  }
   0x4 LB: > { %s1234_s22 = sadd.s32 4294967295, %s1175_s21   ;;  %s833_s23 = sadd.s32 4294967294, %s1175_s21   ;;  %s1175_s21 = sphi %s1219_s21, %s1680_s21   ;;  %s1171_s20 = sphi %s1217_s20, %s1679_s20   ;;  %s1167_s19 = sphi %s1215_s19, %s1678_s19   ;;  %s1163_s18 = sphi %s1213_s18, %s1677_s18  }
   0x5   : > { %s1238_s24 = sadd.s32 1, %s1175_s21   ;;  %s136_s25 = sadd.s32 1, %s1171_s20 }
   0x6   : > { %s133_s26 = ssub.s32 %s1175_s21, %s1238_s24  ;;  %p146_p0 = scmp.ne.s32.totalorder %s1171_s20, %s1167_s19 }
   0x7   : > { %p134_p1 = scmp.eq.s32.totalorder %s133_s26, 0  ;;  %p147_p2 = scmp.eq.s32.totalorder %s1234_s22, 1 }
   0x8   : > { %p152_p3 = scmp.ne.s32.totalorder %s1167_s19, %s1163_s18  ;;  %p153_p4 = scmp.eq.s32.totalorder %s833_s23, 1 }
   0x9   : > { %s1249_s27 = scalar_select %p134_p1, %s1171_s20, %s136_s25  }
   0xa   : > { %p1251_p5 = por %p147_p2, %p146_p0  ;;  %p1255_p6 = por %p153_p4, %p152_p3 }
   0xb   : > { %p834_p7 = scmp.ge.s32.totalorder %s1175_s21, 1  ;;  %p160_p8 = scmp.lt.s32.totalorder %s1175_s21, 3 }
   0xc   : > { %s1668_s28 = scalar_select %p1251_p5, 1, 0 }
   0xd   : > { %s1669_s29 = scalar_select %p1255_p6, 1, 0 }
   0xe   : > { %p1665_p9 = scmp.eq.s32.totalorder %s1234_s22, 0  ;;  %p1262_p10 = pnand %p834_p7, %p160_p8 }
   0xf   : > { %s1177_s6 = smov [#allocation2]   ;;  %s1081_s11 = scalar_lea.hbm %s1662_s3, 4096 }
  0x10   : > { %s1670_s30 = scalar_select %p1262_p10, 1, 0 }
  0x11   : > { %s178_s7 = sshll.u32 %s1177_s6, 4  ;;  %p1033_p11 = pneg %p1262_p10  ;;  %s179_s7 = int_to_ptr.vmem [resolvable:$true] %s178_s7 }
  0x12   : > { %p1082_p13 = scmp.ne.s32.totalorder %s1662_s3, %s1081_s11  ;;  %p1088_p3 = scmp.lt.u32.totalorder %s1081_s11, %s1662_s3 }
  0x13   : > { %p1270_p12 = pnand %p1665_p9, %p1033_p11 }
  0x15   : > { %p1083_p0 = pneg %p1270_p12 }
  0x17   : > { %p1084_p1 = pnand %p1083_p0, %p1082_p13 }
  0x19   : > { %p1085_p2 = pneg %p1084_p1 }
  0x1b   : > { %p1090_p4 = pnand %p1088_p3, %p1085_p2 }
  0x1d   : > { %1093 = shalt.err (!%p1090_p4)
}
  0x1e   : > { %s1094_s16 = scalar_lea.vmem %s179_s7, 4096  ;;  %p1102_p9 = scmp.lt.s32.totalorder %s179_s7, %s179_s7 }
  0x1f   : > { %p1095_p7 = scmp.ne.s32.totalorder %s179_s7, %s1094_s16  ;;  %p1103_p6 = scmp.lt.s32.totalorder %s1094_s16, %s1094_s16 }
  0x21   : > { %p1097_p8 = pnand %p1095_p7, %p1083_p0  ;;  %p1104_p5 = por %p1103_p6, %p1102_p9 }
  0x23   : > { %p1098_p11 = pneg %p1097_p8 }
  0x25   : > { %p1105_p10 = pnand %p1104_p5, %p1098_p11 }
  0x27   : > { %1108 = shalt.err (!%p1105_p10)
}
  0x28   : > { %s1178_s17 = smov 128   ;;  %s1179_s23 = smov 8  }
  0x29   : > { %1036 = dma.hbm_to_vmem [thread:$0]  (!%p1270_p12), %s1662_s3, 4096, %s179_s7, [#allocation3], %s1178_s17, %s1178_s17, %s1179_s23  }
  0x2a   : > { %p1672_p13 = scmp.ne.s32.totalorder %s1670_s30, 0 }
  0x2b   : > { %p1673_p1 = scmp.eq.s32.totalorder (!%p1672_p13), %s1234_s22, 0 }
  0x2c   : > { %207 = sbr.rel (%p1672_p13) target bundleno = 629 (0x275), region = 40 }
  0x33   : > { %1154 = dma.done.wait (%p1673_p1), [#allocation3], 4096   ;;  %p1674_p0 = pmov %p1673_p1 }
  0x34   : > { %v277_v0 = vld [vmem:[%s1660_s1 + $0x8] sm:$0xff]  ;;  %v279_v1 = vld [vmem:[%s1660_s1 + $0x18] sm:$0xff]  ;;  %v276_v2 = vld [vmem:[%s1660_s1] sm:$0xff]  ;;  %s840_s8 = sshll.u32 %s1234_s22, 4  ;;  %s850_s9 = sshll.u32 %s1234_s22, 11 }
  0x35   : > { %1156 = vsyncadd (%p1674_p0), [#allocation3], 4294963200  ;;  %v931_v3 = vpack.c.bf16 %v279_v1, %v277_v0  ;;  %v278_v4 = vld [vmem:[%s1660_s1 + $0x10] sm:$0xff]  ;;  %v281_v5 = vld [vmem:[%s1660_s1 + $0x28] sm:$0xff]  ;;  %p237_p5 = scmp.lt.s32.totalorder %s840_s8, 31  ;;  %s1610_s30 = scalar_lea.hbm %s1664_s5, %s850_s9 }
  0x36   : > { %v283_v6 = vld [vmem:[%s1660_s1 + $0x38] sm:$0xff]  ;;  %v933_v7 = vpack.c.bf16 %v278_v4, %v276_v2  ;;  %v280_v9 = vld [vmem:[%s1660_s1 + $0x20] sm:$0xff]  ;;  %v282_v10 = vld [vmem:[%s1660_s1 + $0x30] sm:$0xff]  ;;  %p1675_p9 = scmp.ne.s32.totalorder %s1668_s28, 0 }
  0x37   : > { %v935_v8 = vpack.c.bf16 %v283_v6, %v281_v5  ;;  %v285_v11 = vld [vmem:[%s1660_s1 + $0x48] sm:$0xff]  ;;  %932 = vmatprep.subr.bf16.mxu0 %v931_v3  ;;  %v287_v12 = vld [vmem:[%s1660_s1 + $0x58] sm:$0xff]  ;;  %v937_v13 = vpack.c.bf16 %v282_v10, %v280_v9  ;;  %v284_v15 = vld [vmem:[%s1660_s1 + $0x40] sm:$0xff]  ;;  %s1682_s8 = smov (!%p237_p5, %s840_s8), 31 }
  0x38   : > { %934 = vmatpush1.bf16.msra.mxu0 %v933_v7  ;;  %v939_v14 = vpack.c.bf16 %v287_v12, %v285_v11  ;;  %v286_v16 = vld [vmem:[%s1660_s1 + $0x50] sm:$0xff]  ;;  %v289_v17 = vld [vmem:[%s1660_s1 + $0x68] sm:$0xff]  ;;  %v291_v18 = vld [vmem:[%s1660_s1 + $0x78] sm:$0xff]  ;;  %s849_s25 = sshll.u32 %s1682_s8, 4  ;;  %s1180_s8 = smov [#allocation5]  }
  0x39   : > { %936 = vmatprep.subr.bf16.mxu0 %v935_v8  ;;  %v941_v19 = vpack.c.bf16 %v286_v16, %v284_v15  ;;  %v943_v20 = vpack.c.bf16 %v291_v18, %v289_v17  ;;  %v288_v21 = vld [vmem:[%s1660_s1 + $0x60] sm:$0xff]  ;;  %v290_v22 = vld [vmem:[%s1660_s1 + $0x70] sm:$0xff]  ;;  %v293_v23 = vld [vmem:[%s1660_s1 + $0x88] sm:$0xff]  ;;  %s1378_s14 = scalar_lea.vmem %s1659_s0, %s849_s25  ;;  %s1113_s13 = sshll.u32 %s1180_s8, 4  ;;  %s1114_s13 = int_to_ptr.vmem [resolvable:$false] %s1113_s13 }
  0x3a   : > { %v295_v24 = vld [vmem:[%s1660_s1 + $0x98] sm:$0xff]  ;;  %v945_v25 = vpack.c.bf16 %v290_v22, %v288_v21  ;;  %v292_v27 = vld [vmem:[%s1660_s1 + $0x80] sm:$0xff]  ;;  %v294_v28 = vld [vmem:[%s1660_s1 + $0x90] sm:$0xff]  ;;  %s1115_s15 = scalar_lea.vmem %s1114_s13, 4096 }
  0x3b   : > { %v947_v26 = vpack.c.bf16 %v295_v24, %v293_v23  ;;  %v297_v29 = vld [vmem:[%s1660_s1 + $0xa8] sm:$0xff]  ;;  %v299_v30 = vld [vmem:[%s1660_s1 + $0xb8] sm:$0xff]  ;;  %v949_v31 = vpack.c.bf16 %v294_v28, %v292_v27  ;;  %v296_v33 = vld [vmem:[%s1660_s1 + $0xa0] sm:$0xff] }
  0x3c   : > { %938 = vmatpush1.bf16.msra.mxu0 %v937_v13  ;;  %v951_v32 = vpack.c.bf16 %v299_v30, %v297_v29  ;;  %v298_v34 = vld [vmem:[%s1660_s1 + $0xb0] sm:$0xff]  ;;  %v301_v35 = vld [vmem:[%s1660_s1 + $0xc8] sm:$0xff]  ;;  %v303_v36 = vld [vmem:[%s1660_s1 + $0xd8] sm:$0xff] }
  0x3d   : > { %940 = vmatprep.subr.bf16.mxu0 %v939_v14  ;;  %v953_v37 = vpack.c.bf16 %v298_v34, %v296_v33  ;;  %v955_v38 = vpack.c.bf16 %v303_v36, %v301_v35  ;;  %v300_v39 = vld [vmem:[%s1660_s1 + $0xc0] sm:$0xff]  ;;  %v302_v40 = vld [vmem:[%s1660_s1 + $0xd0] sm:$0xff]  ;;  %v245_v41 = vld [vmem:[%s1378_s14 + $0x8] sm:$0xff] }
  0x3e   : > { %v305_v42 = vld [vmem:[%s1660_s1 + $0xe8] sm:$0xff]  ;;  %v307_v43 = vld [vmem:[%s1660_s1 + $0xf8] sm:$0xff]  ;;  %416 = vmatprep.mubr.f32.mxu0 %v245_v41  ;;  %v957_v44 = vpack.c.bf16 %v302_v40, %v300_v39  ;;  %v304_v46 = vld [vmem:[%s1660_s1 + $0xe0] sm:$0xff] }
  0x3f   : > { %v959_v45 = vpack.c.bf16 %v307_v43, %v305_v42  ;;  %v306_v47 = vld [vmem:[%s1660_s1 + $0xf0] sm:$0xff]  ;;  %v309_v48 = vld [vmem:[%s1660_s1 + $0x108] sm:$0xff]  ;;  %v311_v49 = vld [vmem:[%s1660_s1 + $0x118] sm:$0xff] }
  0x40   : > { %942 = vmatpush1.bf16.msra.mxu0 %v941_v19  ;;  %v961_v50 = vpack.c.bf16 %v306_v47, %v304_v46  ;;  %v963_v51 = vpack.c.bf16 %v311_v49, %v309_v48  ;;  %v308_v52 = vld [vmem:[%s1660_s1 + $0x100] sm:$0xff]  ;;  %v310_v53 = vld [vmem:[%s1660_s1 + $0x110] sm:$0xff]  ;;  %v313_v54 = vld [vmem:[%s1660_s1 + $0x128] sm:$0xff] }
  0x41   : > { %944 = vmatprep.subr.bf16.mxu0 %v943_v20  ;;  %v315_v55 = vld [vmem:[%s1660_s1 + $0x138] sm:$0xff]  ;;  %v312_v56 = vld [vmem:[%s1660_s1 + $0x120] sm:$0xff]  ;;  %v314_v57 = vld [vmem:[%s1660_s1 + $0x130] sm:$0xff]  ;;  %v965_v58 = vpack.c.bf16 %v310_v53, %v308_v52 }
  0x42   : > { %v317_v59 = vld [vmem:[%s1660_s1 + $0x148] sm:$0xff]  ;;  %v319_v60 = vld [vmem:[%s1660_s1 + $0x158] sm:$0xff]  ;;  %v561_v61 = vld [vmem:[#allocation2 + $0x80] sm:$0xff]  ;;  %v967_v0 = vpack.c.bf16 %v315_v55, %v313_v54  ;;  %v969_v11 = vpack.c.bf16 %v314_v57, %v312_v56 }
  0x43   : > { %v562_v62 = vld [vmem:[#allocation2 + $0x88] sm:$0xff]  ;;  %v545_v63 = vld [vmem:[#allocation2] sm:$0xff]  ;;  %v563_v3 = vld [vmem:[#allocation2 + $0x90] sm:$0xff]  ;;  %v971_v15 = vpack.c.bf16 %v319_v60, %v317_v59 }
  0x44   : > { %946 = vmatpush1.bf16.msra.mxu0 %v945_v25  ;;  %v995_v1 = vpack.c.bf16 %v562_v62, %v561_v61  ;;  %v546_v2 = vld [vmem:[#allocation2 + $0x8] sm:$0xff]  ;;  %v564_v4 = vld [vmem:[#allocation2 + $0x98] sm:$0xff]  ;;  %v547_v7 = vld [vmem:[#allocation2 + $0x10] sm:$0xff] }
  0x45   : > { %948 = vmatprep.subr.bf16.mxu0 %v947_v26  ;;  %v997_v5 = vpack.c.bf16 %v546_v2, %v545_v63  ;;  %v999_v6 = vpack.c.bf16 %v564_v4, %v563_v3  ;;  %v548_v8 = vld [vmem:[#allocation2 + $0x18] sm:$0xff]  ;;  %v565_v9 = vld [vmem:[#allocation2 + $0xa0] sm:$0xff]  ;;  %v566_v10 = vld [vmem:[#allocation2 + $0xa8] sm:$0xff] }
  0x46   : > { %996 = vmatprep.subr.bf16.mxu1 %v995_v1  ;;  %v316_v12 = vld [vmem:[%s1660_s1 + $0x140] sm:$0xff]  ;;  %v318_v13 = vld [vmem:[%s1660_s1 + $0x150] sm:$0xff]  ;;  %v1001_v14 = vpack.c.bf16 %v548_v8, %v547_v7  ;;  %v321_v16 = vld [vmem:[%s1660_s1 + $0x168] sm:$0xff]  ;;  %v1003_v17 = vpack.c.bf16 %v566_v10, %v565_v9 }
  0x47   : > { %998 = vmatpush3.bf16.msra.mxu1 %v997_v5  ;;  %v549_v18 = vld [vmem:[#allocation2 + $0x20] sm:$0xff]  ;;  %v550_v19 = vld [vmem:[#allocation2 + $0x28] sm:$0xff]  ;;  %v323_v20 = vld [vmem:[%s1660_s1 + $0x178] sm:$0xff]  ;;  %v973_v23 = vpack.c.bf16 %v318_v13, %v316_v12 }
  0x48   : > { %950 = vmatpush1.bf16.msra.mxu0 %v949_v31  ;;  %1000 = vmatprep.subr.bf16.mxu1 %v999_v6  ;;  %v567_v21 = vld [vmem:[#allocation2 + $0xb0] sm:$0xff]  ;;  %v568_v22 = vld [vmem:[#allocation2 + $0xb8] sm:$0xff]  ;;  %v320_v24 = vld [vmem:[%s1660_s1 + $0x160] sm:$0xff]  ;;  %v1005_v26 = vpack.c.bf16 %v550_v19, %v549_v18  ;;  %v975_v27 = vpack.c.bf16 %v323_v20, %v321_v16 }
  0x49   : > { %952 = vmatprep.subr.bf16.mxu0 %v951_v32  ;;  %v322_v25 = vld [vmem:[%s1660_s1 + $0x170] sm:$0xff]  ;;  %v325_v28 = vld [vmem:[%s1660_s1 + $0x188] sm:$0xff]  ;;  %v1007_v29 = vpack.c.bf16 %v568_v22, %v567_v21  ;;  %v552_v31 = vld [vmem:[#allocation2 + $0x38] sm:$0xff] }
  0x4a   : > { %v551_v30 = vld [vmem:[#allocation2 + $0x30] sm:$0xff]  ;;  %v327_v32 = vld [vmem:[%s1660_s1 + $0x198] sm:$0xff]  ;;  %v569_v33 = vld [vmem:[#allocation2 + $0xc0] sm:$0xff]  ;;  %v977_v35 = vpack.c.bf16 %v322_v25, %v320_v24 }
  0x4b   : > { %1002 = vmatpush3.bf16.msra.mxu1 %v1001_v14  ;;  %v570_v34 = vld [vmem:[#allocation2 + $0xc8] sm:$0xff]  ;;  %v324_v36 = vld [vmem:[%s1660_s1 + $0x180] sm:$0xff]  ;;  %v979_v39 = vpack.c.bf16 %v327_v32, %v325_v28  ;;  %v572_v46 = vld [vmem:[#allocation2 + $0xd8] sm:$0xff] }
  0x4c   : > { %954 = vmatpush1.bf16.msra.mxu0 %v953_v37  ;;  %1004 = vmatprep.subr.bf16.mxu1 %v1003_v17  ;;  %v326_v37 = vld [vmem:[%s1660_s1 + $0x190] sm:$0xff]  ;;  %v329_v40 = vld [vmem:[%s1660_s1 + $0x1a8] sm:$0xff]  ;;  %v1011_v41 = vpack.c.bf16 %v570_v34, %v569_v33  ;;  %v553_v42 = vld [vmem:[#allocation2 + $0x40] sm:$0xff] }
  0x4d   : > { %956 = vmatprep.subr.bf16.mxu0 %v955_v38  ;;  %v1009_v38 = vpack.c.bf16 %v552_v31, %v551_v30  ;;  %v554_v43 = vld [vmem:[#allocation2 + $0x48] sm:$0xff]  ;;  %v981_v47 = vpack.c.bf16 %v326_v37, %v324_v36  ;;  %v328_v48 = vld [vmem:[%s1660_s1 + $0x1a0] sm:$0xff]  ;;  %v330_v49 = vld [vmem:[%s1660_s1 + $0x1b0] sm:$0xff] }
  0x4e   : > { %v333_v52 = vld [vmem:[%s1660_s1 + $0x1c8] sm:$0xff]  ;;  %v555_v54 = vld [vmem:[#allocation2 + $0x50] sm:$0xff]  ;;  %v556_v55 = vld [vmem:[#allocation2 + $0x58] sm:$0xff]  ;;  %v985_v59 = vpack.c.bf16 %v330_v49, %v328_v48  ;;  %v342_v48 = vlaneseq }
  0x4f   : > { %1006 = vmatpush3.bf16.msra.mxu1 %v1005_v26  ;;  %v335_v56 = vld [vmem:[%s1660_s1 + $0x1d8] sm:$0xff]  ;;  %v573_v57 = vld [vmem:[#allocation2 + $0xe0] sm:$0xff]  ;;  %v1017_v60 = vpack.c.bf16 %v556_v55, %v555_v54  ;;  %v334_v63 = vld [vmem:[%s1660_s1 + $0x1d0] sm:$0xff] }
  0x50   : > { %958 = vmatpush1.bf16.msra.mxu0 %v957_v44  ;;  %1008 = vmatprep.subr.bf16.mxu1 %v1007_v29  ;;  %v331_v44 = vld [vmem:[%s1660_s1 + $0x1b8] sm:$0xff]  ;;  %v987_v61 = vpack.c.bf16 %v335_v56, %v333_v52  ;;  %v332_v62 = vld [vmem:[%s1660_s1 + $0x1c0] sm:$0xff]  ;;  %v337_v1 = vld [vmem:[%s1660_s1 + $0x1e8] sm:$0xff]  ;;  %v343_v49 = vshrl.u32 %v342_v48, 7 }
  0x51   : > { %960 = vmatprep.subr.bf16.mxu0 %v959_v45  ;;  %v571_v45 = vld [vmem:[#allocation2 + $0xd0] sm:$0xff]  ;;  %v339_v2 = vld [vmem:[%s1660_s1 + $0x1f8] sm:$0xff]  ;;  %v989_v3 = vpack.c.bf16 %v334_v63, %v332_v62  ;;  %v336_v5 = vld [vmem:[%s1660_s1 + $0x1e0] sm:$0xff] }
  0x52   : > { %v1015_v53 = vpack.c.bf16 %v572_v46, %v571_v45  ;;  %v991_v4 = vpack.c.bf16 %v339_v2, %v337_v1  ;;  %v338_v6 = vld [vmem:[%s1660_s1 + $0x1f0] sm:$0xff]  ;;  %v244_v8 = vld [vmem:[%s1378_s14] sm:$0xff]  ;;  %v247_v9 = vld [vmem:[%s1378_s14 + $0x18] sm:$0xff]  ;;  %v348_v52 = vsub.s32 1, %v343_v49 }
  0x53   : > { %1010 = vmatpush3.bf16.msra.mxu1 %v1009_v38  ;;  %v993_v7 = vpack.c.bf16 %v338_v6, %v336_v5  ;;  %v246_v10 = vld [vmem:[%s1378_s14 + $0x10] sm:$0xff]  ;;  %v248_v12 = vld [vmem:[%s1378_s14 + $0x20] sm:$0xff]  ;;  %v251_v13 = vld [vmem:[%s1378_s14 + $0x38] sm:$0xff] }
  0x54   : > { %962 = vmatpush1.bf16.msra.mxu0 %v961_v50  ;;  %v1013_v50 = vpack.c.bf16 %v554_v43, %v553_v42  ;;  %1012 = vmatprep.subr.bf16.mxu1 %v1011_v41  ;;  %v250_v14 = vld [vmem:[%s1378_s14 + $0x30] sm:$0xff]  ;;  %v252_v16 = vld [vmem:[%s1378_s14 + $0x40] sm:$0xff]  ;;  %v255_v17 = vld [vmem:[%s1378_s14 + $0x58] sm:$0xff] }
  0x55   : > { %964 = vmatprep.subr.bf16.mxu0 %v963_v51  ;;  %v983_v51 = vpack.c.bf16 %v331_v44, %v329_v40  ;;  %v254_v18 = vld [vmem:[%s1378_s14 + $0x50] sm:$0xff]  ;;  %v257_v19 = vld [vmem:[%s1378_s14 + $0x68] sm:$0xff]  ;;  %v256_v20 = vld [vmem:[%s1378_s14 + $0x60] sm:$0xff] }
  0x56   : > { %v259_v21 = vld [vmem:[%s1378_s14 + $0x78] sm:$0xff]  ;;  %v258_v22 = vld [vmem:[%s1378_s14 + $0x70] sm:$0xff]  ;;  %v260_v24 = vld [vmem:[%s1378_s14 + $0x80] sm:$0xff] }
  0x57   : > { %1014 = vmatpush3.bf16.msra.mxu1 %v1013_v50  ;;  %v263_v25 = vld [vmem:[%s1378_s14 + $0x98] sm:$0xff]  ;;  %v262_v26 = vld [vmem:[%s1378_s14 + $0x90] sm:$0xff]  ;;  %v264_v28 = vld [vmem:[%s1378_s14 + $0xa0] sm:$0xff]  ;;  %v344_v50 = vsub.s32 0, %v343_v49 }
  0x58   : > { %966 = vmatpush1.bf16.msra.mxu0 %v965_v58  ;;  %v574_v58 = vld [vmem:[#allocation2 + $0xe8] sm:$0xff]  ;;  %1016 = vmatprep.subr.bf16.mxu1 %v1015_v53  ;;  %v267_v29 = vld [vmem:[%s1378_s14 + $0xb8] sm:$0xff]  ;;  %v266_v30 = vld [vmem:[%s1378_s14 + $0xb0] sm:$0xff] }
  0x59   : > { %968 = vmatprep.subr.bf16.mxu0 %v967_v0  ;;  %v1019_v0 = vpack.c.bf16 %v574_v58, %v573_v57  ;;  %v269_v31 = vld [vmem:[%s1378_s14 + $0xc8] sm:$0xff]  ;;  %v268_v32 = vld [vmem:[%s1378_s14 + $0xc0] sm:$0xff]  ;;  %v271_v33 = vld [vmem:[%s1378_s14 + $0xd8] sm:$0xff] }
  0x5a   : > { %v270_v34 = vld [vmem:[%s1378_s14 + $0xd0] sm:$0xff]  ;;  %v272_v36 = vld [vmem:[%s1378_s14 + $0xe0] sm:$0xff]  ;;  %v275_v37 = vld [vmem:[%s1378_s14 + $0xf8] sm:$0xff] }
  0x5b   : > { %1018 = vmatpush3.bf16.msra.mxu1 %v1017_v60  ;;  %v274_v38 = vld [vmem:[%s1378_s14 + $0xf0] sm:$0xff]  ;;  %v558_v40 = vld [vmem:[#allocation2 + $0x68] sm:$0xff]  ;;  %v576_v43 = vld [vmem:[#allocation2 + $0xf8] sm:$0xff] }
  0x5c   : > { %970 = vmatpush1.bf16.msra.mxu0 %v969_v11  ;;  %1020 = vmatprep.subr.bf16.mxu1 %v1019_v0  ;;  %v249_v11 = vld [vmem:[%s1378_s14 + $0x28] sm:$0xff]  ;;  %v575_v42 = vld [vmem:[#allocation2 + $0xf0] sm:$0xff]  ;;  %v560_v46 = vld [vmem:[#allocation2 + $0x78] sm:$0xff] }
  0x5d   : > { %972 = vmatprep.subr.bf16.mxu0 %v971_v15  ;;  %v253_v15 = vld [vmem:[%s1378_s14 + $0x48] sm:$0xff]  ;;  %v1023_v44 = vpack.c.bf16 %v576_v43, %v575_v42  ;;  %v559_v45 = vld [vmem:[#allocation2 + $0x70] sm:$0xff] }
  0x60   : > { %974 = vmatpush1.bf16.msra.mxu0 %v973_v23  ;;  %v261_v23 = vld [vmem:[%s1378_s14 + $0x88] sm:$0xff] }
  0x61   : > { %976 = vmatprep.subr.bf16.mxu0 %v975_v27  ;;  %v265_v27 = vld [vmem:[%s1378_s14 + $0xa8] sm:$0xff] }
  0x64   : > { %978 = vmatpush1.bf16.msra.mxu0 %v977_v35  ;;  %v273_v35 = vld [vmem:[%s1378_s14 + $0xe8] sm:$0xff]  ;;  %s233_s14 = sand.u32 1, %s1167_s19  }
  0x65   : > { %980 = vmatprep.subr.bf16.mxu0 %v979_v39  ;;  %v557_v39 = vld [vmem:[#allocation2 + $0x60] sm:$0xff]  ;;  %s839_s23 = sshll.u32 %s233_s14, 7  ;;  %s1618_s12 = scalar_lea.sflag [#allocation4], %s233_s14 }
  0x66   : > { %v1021_v41 = vpack.c.bf16 %v558_v40, %v557_v39  ;;  %s1574_s25 = scalar_lea.vmem [#allocation5], %s839_s23 }
  0x67   : > { %s759_s10 = sshll.u32 %s1574_s25, 4  ;;  %s1612_s10 = int_to_ptr.vmem [resolvable:$true] %s759_s10 }
  0x68   : > { %982 = vmatpush1.bf16.msra.mxu0 %v981_v47  ;;  %1022 = vmatpush3.bf16.msra.mxu1 %v1021_v41  ;;  %v1025_v47 = vpack.c.bf16 %v560_v46, %v559_v45  ;;  %s1109_s22 = scalar_lea.vmem %s1612_s10, 2048  ;;  %p1116_p2 = scmp.lt.s32.totalorder %s1612_s10, %s1114_s13 }
  0x69   : > { %984 = vmatprep.subr.bf16.mxu0 %v983_v51  ;;  %1024 = vmatprep.subr.bf16.mxu1 %v1023_v44  ;;  %v340_v51 = vld [vmem:[%s1661_s2] sm:$0x3]  ;;  %p1110_p6 = scmp.ne.s32.totalorder %s1612_s10, %s1109_s22  ;;  %p1117_p3 = scmp.lt.s32.totalorder %s1115_s15, %s1109_s22 }
  0x6a   : > { %v1529_v53 = vrot.slane %v340_v51, %v344_v50  ;;  %v1531_v54 = vrot.slane %v340_v51, %v348_v52 }
  0x6b   : > { %p1111_p10 = pnand %p1110_p6, %p1675_p9  ;;  %p1118_p4 = por %p1117_p3, %p1116_p2 }
  0x6c   : > { %986 = vmatpush1.bf16.msra.mxu0 %v985_v59  ;;  %1026 = vmatpush3.bf16.msra.mxu1 %v1025_v47 }
  0x6d   : > { %988 = vmatprep.subr.bf16.mxu0 %v987_v61  ;;  %p1112_p12 = pneg %p1111_p10 }
  0x6f   : > { %p1119_p7 = pnand %p1118_p4, %p1112_p12 }
  0x70   : > { %990 = vmatpush1.bf16.msra.mxu0 %v989_v3 }
  0x71   : > { %992 = vmatprep.subr.bf16.mxu0 %v991_v4 }
  0x74   : > { %994 = vmatpush1.bf16.msra.mxu0 %v993_v7 }
  0x77   : > { %417 = vmatmul.mubr.f32.vlgmr.msra.gmra.mrb[0].mxu0 %v244_v8 }
  0x78   : > { %422 = vmatprep.mubr.f32.mxu0 %v247_v9 }
  0x7b   : > { %423 = vmatmul.mubr.f32.gmra.mrb[2].mxu0 %v246_v10 }
  0x7c   : > { %428 = vmatprep.mubr.f32.mxu0 %v249_v11 }
  0x7f   : > { %429 = vmatmul.mubr.f32.gmra.mrb[4].mxu0 %v248_v12 }
  0x80   : > { %434 = vmatprep.mubr.f32.mxu0 %v251_v13 }
  0x83   : > { %435 = vmatmul.mubr.f32.gmra.mrb[6].mxu0 %v250_v14 }
  0x84   : > { %440 = vmatprep.mubr.f32.mxu0 %v253_v15 }
  0x87   : > { %441 = vmatmul.mubr.f32.gmra.mrb[8].mxu0 %v252_v16 }
  0x88   : > { %446 = vmatprep.mubr.f32.mxu0 %v255_v17 }
  0x8b   : > { %447 = vmatmul.mubr.f32.gmra.mrb[10].mxu0 %v254_v18 }
  0x8c   : > { %452 = vmatprep.mubr.f32.mxu0 %v257_v19 }
  0x8f   : > { %453 = vmatmul.mubr.f32.gmra.mrb[12].mxu0 %v256_v20 }
  0x90   : > { %458 = vmatprep.mubr.f32.mxu0 %v259_v21 }
  0x93   : > { %459 = vmatmul.mubr.f32.gmra.mrb[14].mxu0 %v258_v22 }
  0x94   : > { %464 = vmatprep.mubr.f32.mxu0 %v261_v23 }
  0x97   : > { %465 = vmatmul.mubr.f32.gmra.mrb[16].mxu0 %v260_v24 }
  0x98   : > { %470 = vmatprep.mubr.f32.mxu0 %v263_v25 }
  0x9b   : > { %471 = vmatmul.mubr.f32.gmra.mrb[18].mxu0 %v262_v26 }
  0x9c   : > { %476 = vmatprep.mubr.f32.mxu0 %v265_v27 }
  0x9f   : > { %477 = vmatmul.mubr.f32.gmra.mrb[20].mxu0 %v264_v28 }
  0xa0   : > { %482 = vmatprep.mubr.f32.mxu0 %v267_v29 }
  0xa3   : > { %483 = vmatmul.mubr.f32.gmra.mrb[22].mxu0 %v266_v30 }
  0xa4   : > { %488 = vmatprep.mubr.f32.mxu0 %v269_v31 }
  0xa7   : > { %489 = vmatmul.mubr.f32.gmra.mrb[24].mxu0 %v268_v32 }
  0xa8   : > { %494 = vmatprep.mubr.f32.mxu0 %v271_v33 }
  0xab   : > { %495 = vmatmul.mubr.f32.gmra.mrb[26].mxu0 %v270_v34 }
  0xac   : > { %500 = vmatprep.mubr.f32.mxu0 %v273_v35 }
  0xaf   : > { %501 = vmatmul.mubr.f32.gmra.mrb[28].mxu0 %v272_v36 }
  0xb0   : > { %506 = vmatprep.mubr.f32.mxu0 %v275_v37 }
  0xb3   : > { %507 = vmatmul.mubr.f32.gmra.mrb[30].mxu0 %v274_v38 }
 0x14a   : > { %v418_v55 = vpop.f32.mrb[0].mxu0 }
 0x14b   : > { %v419_v56 = vadd.f32 %v418_v55, %v1529_v53  ;;  %v420_v57 = vpop.f32.mrb[1].mxu0 }
 0x14c   : > { %v421_v58 = vadd.f32 %v420_v57, %v1531_v54 }
 0x14d   : > { %v513_v61 = vmax.f32 %v419_v56, 0.0 }
 0x14e   : > { %v424_v59 = vpop.f32.mrb[2].mxu0  ;;  %v514_v60 = vmax.f32 %v421_v58, 0.0 }
 0x14f   : > { %v425_v62 = vadd.f32 %v424_v59, %v1529_v53  ;;  %v426_v63 = vpop.f32.mrb[3].mxu0 }
 0x150   : > { %v427_v0 = vadd.f32 %v426_v63, %v1531_v54  ;;  %648 = vmatprep.mubr.f32.mxu1 %v514_v60 }
 0x151   : > { %649 = vmatmul.mubr.f32.vlgmr.msra.gmra.mrb[0].mxu1 %v513_v61  ;;  %v515_v3 = vmax.f32 %v425_v62, 0.0 }
 0x152   : > { %v516_v1 = vmax.f32 %v427_v0, 0.0  ;;  %v430_v2 = vpop.f32.mrb[4].mxu0 }
 0x153   : > { %v431_v4 = vadd.f32 %v430_v2, %v1529_v53  ;;  %v432_v5 = vpop.f32.mrb[5].mxu0 }
 0x154   : > { %v433_v6 = vadd.f32 %v432_v5, %v1531_v54  ;;  %653 = vmatprep.mubr.f32.mxu1 %v516_v1 }
 0x155   : > { %654 = vmatmul.mubr.f32.gmra.mrb[2].mxu1 %v515_v3  ;;  %v517_v9 = vmax.f32 %v431_v4, 0.0 }
 0x156   : > { %v518_v7 = vmax.f32 %v433_v6, 0.0  ;;  %v436_v8 = vpop.f32.mrb[6].mxu0 }
 0x157   : > { %v437_v10 = vadd.f32 %v436_v8, %v1529_v53  ;;  %v438_v11 = vpop.f32.mrb[7].mxu0 }
 0x158   : > { %v439_v12 = vadd.f32 %v438_v11, %v1531_v54  ;;  %658 = vmatprep.mubr.f32.mxu1 %v518_v7 }
 0x159   : > { %659 = vmatmul.mubr.f32.gmra.mrb[4].mxu1 %v517_v9  ;;  %v519_v15 = vmax.f32 %v437_v10, 0.0 }
 0x15a   : > { %v520_v13 = vmax.f32 %v439_v12, 0.0  ;;  %v442_v14 = vpop.f32.mrb[8].mxu0 }
 0x15b   : > { %v443_v16 = vadd.f32 %v442_v14, %v1529_v53  ;;  %v444_v17 = vpop.f32.mrb[9].mxu0 }
 0x15c   : > { %v445_v18 = vadd.f32 %v444_v17, %v1531_v54  ;;  %663 = vmatprep.mubr.f32.mxu1 %v520_v13 }
 0x15d   : > { %664 = vmatmul.mubr.f32.gmra.mrb[6].mxu1 %v519_v15  ;;  %v521_v21 = vmax.f32 %v443_v16, 0.0 }
 0x15e   : > { %v522_v19 = vmax.f32 %v445_v18, 0.0  ;;  %v448_v20 = vpop.f32.mrb[10].mxu0 }
 0x15f   : > { %v449_v22 = vadd.f32 %v448_v20, %v1529_v53  ;;  %v450_v23 = vpop.f32.mrb[11].mxu0 }
 0x160   : > { %v451_v24 = vadd.f32 %v450_v23, %v1531_v54  ;;  %668 = vmatprep.mubr.f32.mxu1 %v522_v19 }
 0x161   : > { %669 = vmatmul.mubr.f32.gmra.mrb[8].mxu1 %v521_v21  ;;  %v523_v27 = vmax.f32 %v449_v22, 0.0 }
 0x162   : > { %v524_v25 = vmax.f32 %v451_v24, 0.0  ;;  %v454_v26 = vpop.f32.mrb[12].mxu0 }
 0x163   : > { %v455_v28 = vadd.f32 %v454_v26, %v1529_v53  ;;  %v456_v29 = vpop.f32.mrb[13].mxu0  ;;  %v1571_v26 = vld [vmem:[%s1663_s4] ss:$0 sm:$0xff] }
 0x164   : > { %v457_v30 = vadd.f32 %v456_v29, %v1531_v54  ;;  %673 = vmatprep.mubr.f32.mxu1 %v524_v25 }
 0x165   : > { %674 = vmatmul.mubr.f32.gmra.mrb[10].mxu1 %v523_v27  ;;  %v525_v33 = vmax.f32 %v455_v28, 0.0 }
 0x166   : > { %v526_v31 = vmax.f32 %v457_v30, 0.0  ;;  %v460_v32 = vpop.f32.mrb[14].mxu0 }
 0x167   : > { %v461_v34 = vadd.f32 %v460_v32, %v1529_v53  ;;  %v462_v35 = vpop.f32.mrb[15].mxu0 }
 0x168   : > { %v463_v36 = vadd.f32 %v462_v35, %v1531_v54  ;;  %678 = vmatprep.mubr.f32.mxu1 %v526_v31 }
 0x169   : > { %679 = vmatmul.mubr.f32.gmra.mrb[12].mxu1 %v525_v33  ;;  %v527_v39 = vmax.f32 %v461_v34, 0.0 }
 0x16a   : > { %v528_v37 = vmax.f32 %v463_v36, 0.0  ;;  %v466_v38 = vpop.f32.mrb[16].mxu0 }
 0x16b   : > { %v467_v40 = vadd.f32 %v466_v38, %v1529_v53  ;;  %v468_v41 = vpop.f32.mrb[17].mxu0 }
 0x16c   : > { %v469_v42 = vadd.f32 %v468_v41, %v1531_v54  ;;  %683 = vmatprep.mubr.f32.mxu1 %v528_v37 }
 0x16d   : > { %684 = vmatmul.mubr.f32.gmra.mrb[14].mxu1 %v527_v39  ;;  %v529_v45 = vmax.f32 %v467_v40, 0.0 }
 0x16e   : > { %v530_v43 = vmax.f32 %v469_v42, 0.0  ;;  %v472_v44 = vpop.f32.mrb[18].mxu0 }
 0x16f   : > { %v473_v46 = vadd.f32 %v472_v44, %v1529_v53  ;;  %v474_v47 = vpop.f32.mrb[19].mxu0 }
 0x170   : > { %v475_v48 = vadd.f32 %v474_v47, %v1531_v54  ;;  %688 = vmatprep.mubr.f32.mxu1 %v530_v43 }
 0x171   : > { %689 = vmatmul.mubr.f32.gmra.mrb[16].mxu1 %v529_v45  ;;  %v531_v51 = vmax.f32 %v473_v46, 0.0 }
 0x172   : > { %v532_v49 = vmax.f32 %v475_v48, 0.0  ;;  %v478_v50 = vpop.f32.mrb[20].mxu0 }
 0x173   : > { %v479_v52 = vadd.f32 %v478_v50, %v1529_v53  ;;  %v480_v55 = vpop.f32.mrb[21].mxu0 }
 0x174   : > { %v481_v56 = vadd.f32 %v480_v55, %v1531_v54  ;;  %693 = vmatprep.mubr.f32.mxu1 %v532_v49 }
 0x175   : > { %694 = vmatmul.mubr.f32.gmra.mrb[18].mxu1 %v531_v51  ;;  %v533_v59 = vmax.f32 %v479_v52, 0.0 }
 0x176   : > { %v534_v57 = vmax.f32 %v481_v56, 0.0  ;;  %v484_v58 = vpop.f32.mrb[22].mxu0 }
 0x177   : > { %v485_v60 = vadd.f32 %v484_v58, %v1529_v53  ;;  %v486_v61 = vpop.f32.mrb[23].mxu0 }
 0x178   : > { %v487_v62 = vadd.f32 %v486_v61, %v1531_v54  ;;  %698 = vmatprep.mubr.f32.mxu1 %v534_v57 }
 0x179   : > { %699 = vmatmul.mubr.f32.gmra.mrb[20].mxu1 %v533_v59  ;;  %v535_v1 = vmax.f32 %v485_v60, 0.0 }
 0x17a   : > { %v536_v63 = vmax.f32 %v487_v62, 0.0  ;;  %v490_v0 = vpop.f32.mrb[24].mxu0 }
 0x17b   : > { %v491_v2 = vadd.f32 %v490_v0, %v1529_v53  ;;  %v492_v3 = vpop.f32.mrb[25].mxu0 }
 0x17c   : > { %v493_v4 = vadd.f32 %v492_v3, %v1531_v54  ;;  %703 = vmatprep.mubr.f32.mxu1 %v536_v63 }
 0x17d   : > { %704 = vmatmul.mubr.f32.gmra.mrb[22].mxu1 %v535_v1  ;;  %v537_v7 = vmax.f32 %v491_v2, 0.0 }
 0x17e   : > { %v538_v5 = vmax.f32 %v493_v4, 0.0  ;;  %v496_v6 = vpop.f32.mrb[26].mxu0 }
 0x17f   : > { %v497_v8 = vadd.f32 %v496_v6, %v1529_v53  ;;  %v498_v9 = vpop.f32.mrb[27].mxu0 }
 0x180   : > { %v499_v10 = vadd.f32 %v498_v9, %v1531_v54  ;;  %708 = vmatprep.mubr.f32.mxu1 %v538_v5 }
 0x181   : > { %709 = vmatmul.mubr.f32.gmra.mrb[24].mxu1 %v537_v7  ;;  %v539_v13 = vmax.f32 %v497_v8, 0.0 }
 0x182   : > { %v540_v11 = vmax.f32 %v499_v10, 0.0  ;;  %v502_v12 = vpop.f32.mrb[28].mxu0 }
 0x183   : > { %v503_v14 = vadd.f32 %v502_v12, %v1529_v53  ;;  %v504_v15 = vpop.f32.mrb[29].mxu0 }
 0x184   : > { %v505_v16 = vadd.f32 %v504_v15, %v1531_v54  ;;  %713 = vmatprep.mubr.f32.mxu1 %v540_v11 }
 0x185   : > { %714 = vmatmul.mubr.f32.gmra.mrb[26].mxu1 %v539_v13  ;;  %v541_v19 = vmax.f32 %v503_v14, 0.0 }
 0x186   : > { %v542_v17 = vmax.f32 %v505_v16, 0.0  ;;  %v508_v18 = vpop.f32.mrb[30].mxu0 }
 0x187   : > { %v509_v20 = vadd.f32 %v508_v18, %v1529_v53  ;;  %v510_v21 = vpop.f32.mrb[31].mxu0 }
 0x188   : > { %v511_v22 = vadd.f32 %v510_v21, %v1531_v54  ;;  %718 = vmatprep.mubr.f32.mxu1 %v542_v17 }
 0x189   : > { %719 = vmatmul.mubr.f32.gmra.mrb[28].mxu1 %v541_v19  ;;  %v543_v24 = vmax.f32 %v509_v20, 0.0 }
 0x18a   : > { %v544_v23 = vmax.f32 %v511_v22, 0.0 }
 0x18c   : > { %723 = vmatprep.mubr.f32.mxu1 %v544_v23 }
 0x18d   : > { %724 = vmatmul.mubr.f32.gmra.mrb[30].mxu1 %v543_v24 }
 0x224   : > { %v883_v25 = vpop.f32.mrb[0].mxu1 }
 0x225   : > { %v884_v27 = vpop.f32.mrb[1].mxu1 }
 0x226   : > { %v885_v53 = vadd.f32 %v884_v27, %v883_v25 }
 0x228   : > { %v651_v28 = vadd.f32 %v885_v53, %v1571_v26  ;;  %v886_v54 = vpop.f32.mrb[2].mxu1 }
 0x229   : > { %v887_v29 = vpop.f32.mrb[3].mxu1 }
 0x22a   : > { %729 = vst [vmem:[%s1574_s25] sm:$0xff] %v651_v28  ;;  %v888_v30 = vadd.f32 %v887_v29, %v886_v54 }
 0x22c   : > { %v656_v31 = vadd.f32 %v888_v30, %v1571_v26  ;;  %v889_v32 = vpop.f32.mrb[4].mxu1 }
 0x22d   : > { %v890_v33 = vpop.f32.mrb[5].mxu1 }
 0x22e   : > { %730 = vst [vmem:[%s1574_s25 + $0x8] sm:$0xff] %v656_v31  ;;  %v891_v34 = vadd.f32 %v890_v33, %v889_v32 }
 0x230   : > { %v661_v35 = vadd.f32 %v891_v34, %v1571_v26  ;;  %v892_v36 = vpop.f32.mrb[6].mxu1 }
 0x231   : > { %v893_v37 = vpop.f32.mrb[7].mxu1 }
 0x232   : > { %731 = vst [vmem:[%s1574_s25 + $0x10] sm:$0xff] %v661_v35  ;;  %v894_v38 = vadd.f32 %v893_v37, %v892_v36 }
 0x234   : > { %v666_v39 = vadd.f32 %v894_v38, %v1571_v26  ;;  %v895_v40 = vpop.f32.mrb[8].mxu1 }
 0x235   : > { %v896_v41 = vpop.f32.mrb[9].mxu1 }
 0x236   : > { %732 = vst [vmem:[%s1574_s25 + $0x18] sm:$0xff] %v666_v39  ;;  %v897_v42 = vadd.f32 %v896_v41, %v895_v40 }
 0x238   : > { %v671_v43 = vadd.f32 %v897_v42, %v1571_v26  ;;  %v898_v44 = vpop.f32.mrb[10].mxu1 }
 0x239   : > { %v899_v45 = vpop.f32.mrb[11].mxu1 }
 0x23a   : > { %733 = vst [vmem:[%s1574_s25 + $0x20] sm:$0xff] %v671_v43  ;;  %v900_v46 = vadd.f32 %v899_v45, %v898_v44 }
 0x23c   : > { %v676_v47 = vadd.f32 %v900_v46, %v1571_v26  ;;  %v901_v48 = vpop.f32.mrb[12].mxu1 }
 0x23d   : > { %v902_v49 = vpop.f32.mrb[13].mxu1 }
 0x23e   : > { %734 = vst [vmem:[%s1574_s25 + $0x28] sm:$0xff] %v676_v47  ;;  %v903_v50 = vadd.f32 %v902_v49, %v901_v48 }
 0x240   : > { %v681_v51 = vadd.f32 %v903_v50, %v1571_v26  ;;  %v904_v52 = vpop.f32.mrb[14].mxu1 }
 0x241   : > { %v905_v55 = vpop.f32.mrb[15].mxu1 }
 0x242   : > { %735 = vst [vmem:[%s1574_s25 + $0x30] sm:$0xff] %v681_v51  ;;  %v906_v56 = vadd.f32 %v905_v55, %v904_v52 }
 0x244   : > { %v686_v57 = vadd.f32 %v906_v56, %v1571_v26  ;;  %v907_v58 = vpop.f32.mrb[16].mxu1 }
 0x245   : > { %v908_v59 = vpop.f32.mrb[17].mxu1 }
 0x246   : > { %736 = vst [vmem:[%s1574_s25 + $0x38] sm:$0xff] %v686_v57  ;;  %v909_v60 = vadd.f32 %v908_v59, %v907_v58 }
 0x248   : > { %v691_v61 = vadd.f32 %v909_v60, %v1571_v26  ;;  %v910_v62 = vpop.f32.mrb[18].mxu1 }
 0x249   : > { %v911_v63 = vpop.f32.mrb[19].mxu1 }
 0x24a   : > { %737 = vst [vmem:[%s1574_s25 + $0x40] sm:$0xff] %v691_v61  ;;  %v912_v0 = vadd.f32 %v911_v63, %v910_v62 }
 0x24c   : > { %v696_v1 = vadd.f32 %v912_v0, %v1571_v26  ;;  %v913_v2 = vpop.f32.mrb[20].mxu1 }
 0x24d   : > { %v914_v3 = vpop.f32.mrb[21].mxu1 }
 0x24e   : > { %738 = vst [vmem:[%s1574_s25 + $0x48] sm:$0xff] %v696_v1  ;;  %v915_v4 = vadd.f32 %v914_v3, %v913_v2 }
 0x250   : > { %v701_v5 = vadd.f32 %v915_v4, %v1571_v26  ;;  %v916_v6 = vpop.f32.mrb[22].mxu1 }
 0x251   : > { %v917_v7 = vpop.f32.mrb[23].mxu1 }
 0x252   : > { %739 = vst [vmem:[%s1574_s25 + $0x50] sm:$0xff] %v701_v5  ;;  %v918_v8 = vadd.f32 %v917_v7, %v916_v6 }
 0x254   : > { %v706_v9 = vadd.f32 %v918_v8, %v1571_v26  ;;  %v919_v10 = vpop.f32.mrb[24].mxu1 }
 0x255   : > { %v920_v11 = vpop.f32.mrb[25].mxu1 }
 0x256   : > { %740 = vst [vmem:[%s1574_s25 + $0x58] sm:$0xff] %v706_v9  ;;  %v921_v12 = vadd.f32 %v920_v11, %v919_v10 }
 0x258   : > { %v711_v13 = vadd.f32 %v921_v12, %v1571_v26  ;;  %v922_v14 = vpop.f32.mrb[26].mxu1 }
 0x259   : > { %v923_v15 = vpop.f32.mrb[27].mxu1 }
 0x25a   : > { %741 = vst [vmem:[%s1574_s25 + $0x60] sm:$0xff] %v711_v13  ;;  %v924_v16 = vadd.f32 %v923_v15, %v922_v14 }
 0x25c   : > { %v716_v17 = vadd.f32 %v924_v16, %v1571_v26  ;;  %v925_v18 = vpop.f32.mrb[28].mxu1 }
 0x25d   : > { %v926_v19 = vpop.f32.mrb[29].mxu1 }
 0x25e   : > { %742 = vst [vmem:[%s1574_s25 + $0x68] sm:$0xff] %v716_v17  ;;  %v927_v20 = vadd.f32 %v926_v19, %v925_v18 }
 0x260   : > { %v721_v21 = vadd.f32 %v927_v20, %v1571_v26  ;;  %v928_v22 = vpop.f32.mrb[30].mxu1 }
 0x261   : > { %v929_v23 = vpop.f32.mrb[31].mxu1 }
 0x262   : > { %743 = vst [vmem:[%s1574_s25 + $0x70] sm:$0xff] %v721_v21  ;;  %v930_v24 = vadd.f32 %v929_v23, %v928_v22 }
 0x264   : > { %v726_v25 = vadd.f32 %v930_v24, %v1571_v26 }
 0x266   : > { %744 = vst [vmem:[%s1574_s25 + $0x78] sm:$0xff] %v726_v25 }
 0x267   : > { %1122 = shalt.err (!%p1119_p7)
}
 0x268   : > { %s1123_s16 = scalar_lea.hbm %s1610_s30, 2048  ;;  %s1127_s23 = scalar_lea.hbm %s1664_s5, 4096 }
 0x269   : > { %p1124_p8 = scmp.ne.s32.totalorder %s1610_s30, %s1123_s16  ;;  %p1128_p1 = scmp.lt.u32.totalorder %s1610_s30, %s1664_s5 }
 0x26a   : > { %p1129_p0 = scmp.lt.u32.totalorder %s1127_s23, %s1123_s16  ;;  %p1131_p6 = scmp.lt.u32.totalorder %s1123_s16, %s1610_s30 }
 0x26b   : > { %p1125_p11 = pnand %p1124_p8, %p1675_p9 }
 0x26c   : > { %p1130_p5 = por %p1129_p0, %p1128_p1 }
 0x26d   : > { %p1126_p13 = pneg %p1125_p11 }
 0x26e   : > { %p1132_p10 = por %p1131_p6, %p1130_p5 }
 0x270   : > { %p1133_p12 = pnand %p1132_p10, %p1126_p13 }
 0x272   : > { %1136 = shalt.err (!%p1133_p12)
}
 0x273   : > { %s1181_s25 = smov 128   ;;  %s1182_s9 = smov 8  }
 0x274   : > { %1031 = dma.vmem_to_hbm [thread:$0]  (%p1675_p9), %s1612_s10, 2048, %s1610_s30, %s1618_s12, %s1181_s25, %s1181_s25, %s1182_s9  }
 0x275 PF: > { %p1043_p2 = scmp.ge.s32.totalorder %s1175_s21, 2  ;;  %s774_s11 = sand.u32 1, %s1163_s18  }
 0x276   : > { %p1676_p3 = scmp.ne.s32.totalorder %s1669_s29, 0  ;;  %s775_s7 = scalar_lea.sflag [#allocation4], %s774_s11 }
 0x278   : > { %p1038_p4 = pnand %p1043_p2, %p1676_p3 }
 0x27a   : > { %1158 = dma.done.wait (!%p1038_p4), %s775_s7, 2048  }
 0x27b   : > { %1160 = vsyncadd (!%p1038_p4), %s775_s7, 4294965248  ;;  %p16_p7 = scmp.ge.s32.totalorder %s1238_s24, 4   ;;  %s1677_s18 = smov %s1167_s19 }
 0x27c   : > { %s1678_s19 = smov %s1171_s20  ;;  %s1679_s20 = smov %s1249_s27 }
 0x27d   : > { %s1680_s21 = smov %s1238_s24  ;;  %18 = sbr.rel (!%p16_p7) target bundleno = 4 (0x4), region = 80 }
 0x284   :  { %780 = vsyncpa [#allocation3], 1 }
 0x285   :  { %782 = vsyncpa [#allocation3 + $0x1], 1 }
 0x286   :  { %783 = vsyncpa [#allocation4], 1 }
 0x287   :  { %785 = vsyncpa [#allocation4 + $0x1], 1 }

// kernel: two_tower_forward.2
= control target key start
LH: loop header
LB: loop body
LE: loop exit
PB: predicated region body
PF: predicated region fallthrough
CT: control target
= control target key end

     0   :  { %10 = vsyncpa [#allocation3], 0  ;;  %s1628_s0 = inlined_call_operand.hbm [shape: f32[256,128], index: 0, kind: input, shape index: {}]   ;;  %s1629_s1 = inlined_call_operand.hbm [shape: f32[128,256], index: 1, kind: input, shape index: {}]   ;;  %s1630_s2 = inlined_call_operand.vmem [shape: f32[1,256], index: 2, kind: input, shape index: {}]   ;;  %s1631_s3 = inlined_call_operand.hbm [shape: f32[256,128], index: 3, kind: input, shape index: {}]   ;;  %s1632_s4 = inlined_call_operand.vmem [shape: f32[1,128], index: 4, kind: input, shape index: {}]   ;;  %s1633_s5 = inlined_call_operand.hbm [shape: f32[256,128], index: 5, kind: output, shape index: {}]  }
   0x1   :  { %12 = vsyncpa [#allocation3 + $0x1], 0 }
   0x2   :  { %13 = vsyncpa [#allocation6], 0 }
   0x3   :  { %14 = vsyncpa [#allocation4], 0 }
   0x4   :  { %16 = vsyncpa [#allocation4 + $0x1], 0  ;;  %s1271_s18 = smov 0   ;;  %s1273_s19 = smov 0  }
   0x5   :  { %s1275_s20 = smov 0   ;;  %s1277_s21 = smov 0  }
   0x6 LB: > { %s1292_s22 = sadd.s32 4294967295, %s1228_s21   ;;  %s833_s23 = sadd.s32 4294967294, %s1228_s21   ;;  %s1228_s21 = sphi %s1277_s21, %s1653_s21   ;;  %s1224_s20 = sphi %s1275_s20, %s1652_s20   ;;  %s1220_s19 = sphi %s1273_s19, %s1651_s19   ;;  %s1216_s18 = sphi %s1271_s18, %s1650_s18  }
   0x7   : > { %p42_p0 = scmp.ne.s32.totalorder %s1220_s19, %s1216_s18  ;;  %p1634_p1 = scmp.eq.s32.totalorder %s1292_s22, 0 }
   0x8   : > { %p156_p3 = scmp.eq.s32.totalorder %s833_s23, 1  ;;  %p834_p5 = scmp.ge.s32.totalorder %s1228_s21, 1 }
   0x9   : > { %p1301_p4 = por %p1634_p1, %p42_p0  ;;  %p163_p7 = scmp.lt.s32.totalorder %s1228_s21, 3 }
   0xa   : > { %p1306_p6 = por %p156_p3, %p42_p0  ;;  %s1230_s27 = smov [#allocation5]  }
   0xb   : > { %s1637_s24 = scalar_select %p1301_p4, 1, 0 }
   0xc   : > { %s1638_s25 = scalar_select %p1306_p6, 1, 0 }
   0xd   : > { %p1311_p8 = pnand %p834_p5, %p163_p7  ;;  %s175_s28 = sshll.u32 %s1230_s27, 4  ;;  %s1315_s28 = int_to_ptr.vmem [resolvable:$true] %s175_s28 }
   0xe   : > { %s1231_s30 = smov [#allocation7]   ;;  %s1072_s9 = scalar_lea.hbm %s1629_s1, 4096 }
   0xf   : > { %p1010_p9 = pneg %p1311_p8  ;;  %s191_s6 = sshll.u32 %s1231_s30, 4  ;;  %s1326_s6 = int_to_ptr.vmem [resolvable:$true] %s191_s6 }
  0x10   : > { %p1073_p12 = scmp.ne.s32.totalorder %s1629_s1, %s1072_s9  ;;  %p1079_p5 = scmp.lt.u32.totalorder %s1072_s9, %s1629_s1 }
  0x11   : > { %p1322_p11 = pnand %p1010_p9, %p1634_p1 }
  0x13   : > { %p1074_p13 = pneg %p1322_p11 }
  0x15   : > { %p1075_p0 = pnand %p1074_p13, %p1073_p12 }
  0x17   : > { %p1076_p3 = pneg %p1075_p0 }
  0x19   : > { %p1081_p7 = pnand %p1079_p5, %p1076_p3 }
  0x1b   : > { %1084 = shalt.err (!%p1081_p7)
}
  0x1c   : > { %s1085_s14 = scalar_lea.vmem %s1315_s28, 4096  ;;  %p1093_p2 = scmp.lt.s32.totalorder %s1315_s28, %s1315_s28 }
  0x1d   : > { %p1086_p9 = scmp.ne.s32.totalorder %s1315_s28, %s1085_s14  ;;  %p1094_p12 = scmp.lt.s32.totalorder %s1085_s14, %s1085_s14 }
  0x1f   : > { %p1088_p10 = pnand %p1086_p9, %p1074_p13  ;;  %p1095_p0 = por %p1094_p12, %p1093_p2 }
  0x21   : > { %p1089_p1 = pneg %p1088_p10 }
  0x23   : > { %p1096_p6 = pnand %p1095_p0, %p1089_p1 }
  0x25   : > { %1099 = shalt.err (!%p1096_p6)
}
  0x26   : > { %s1232_s15 = smov 256   ;;  %s1233_s16 = smov 16  }
  0x27   : > { %1013 = dma.hbm_to_vmem [thread:$0]  (!%p1322_p11), %s1629_s1, 4096, %s1315_s28, [#allocation6], %s1232_s15, %s1232_s15, %s1233_s16  }
  0x28   : > { %s1100_s7 = scalar_lea.hbm %s1631_s3, 4096 }
  0x29   : > { %p1101_p2 = scmp.ne.s32.totalorder %s1631_s3, %s1100_s7  ;;  %p1107_p10 = scmp.lt.u32.totalorder %s1100_s7, %s1631_s3 }
  0x2b   : > { %p1103_p1 = pnand %p1101_p2, %p1074_p13 }
  0x2d   : > { %p1104_p6 = pneg %p1103_p1 }
  0x2f   : > { %p1109_p3 = pnand %p1107_p10, %p1104_p6 }
  0x31   : > { %1112 = shalt.err (!%p1109_p3)
}
  0x32   : > { %s1113_s28 = scalar_lea.vmem %s1326_s6, 4096  ;;  %p1121_p12 = scmp.lt.s32.totalorder %s1326_s6, %s1326_s6 }
  0x33   : > { %p1114_p5 = scmp.ne.s32.totalorder %s1326_s6, %s1113_s28  ;;  %p1122_p0 = scmp.lt.s32.totalorder %s1113_s28, %s1113_s28 }
  0x35   : > { %p1116_p7 = pnand %p1114_p5, %p1074_p13  ;;  %p1123_p2 = por %p1122_p0, %p1121_p12 }
  0x37   : > { %p1117_p9 = pneg %p1116_p7 }
  0x39   : > { %p1124_p1 = pnand %p1123_p2, %p1117_p9 }
  0x3b   : > { %1127 = shalt.err (!%p1124_p1)
}
  0x3c   : > { %s1234_s12 = smov 128   ;;  %s1235_s13 = smov 8  }
  0x3d   : > { %1016 = dma.hbm_to_vmem [thread:$0]  (!%p1322_p11), %s1631_s3, 4096, %s1326_s6, [#allocation6], %s1234_s12, %s1234_s12, %s1235_s13  }
  0x3e   : > { %s1384_s16 = sadd.s32 1, %s1228_s21   ;;  %s29_s23 = sadd.s32 1, %s1224_s20 }
  0x3f   : > { %s26_s17 = ssub.s32 %s1228_s21, %s1384_s16  ;;  %p36_p6 = scmp.ne.s32.totalorder %s1224_s20, %s1220_s19 }
  0x40   : > { %p27_p13 = scmp.eq.s32.totalorder %s26_s17, 0  ;;  %p37_p10 = scmp.eq.s32.totalorder %s1228_s21, 0 }
  0x41   : > { %p1641_p5 = scmp.eq.s32.totalorder %s1292_s22, 1  ;;  %p1027_p9 = scmp.lt.s32.totalorder %s1228_s21, 2 }
  0x42   : > { %s1393_s27 = scalar_select %p27_p13, %s1224_s20, %s29_s23  }
  0x43   : > { %p38_p3 = por %p37_p10, %p36_p6  ;;  %p1397_p7 = por %p1641_p5, %p36_p6 }
  0x44   : > { %s208_s30 = sand.u32 1, %s1224_s20   ;;  %s852_s6 = sshll.u32 %s1228_s21, 11 }
  0x45   : > { %s1642_s29 = scalar_select %p1397_p7, 1, 0 }
  0x46   : > { %s838_s7 = sshll.u32 %s208_s30, 7  ;;  %s1407_s10 = scalar_lea.hbm %s1628_s0, %s852_s6 }
  0x47   : > { %s212_s11 = scalar_lea.vmem [#allocation2], %s838_s7  ;;  %p1411_p11 = pnand %p1027_p9, %p38_p3 }
  0x48   : > { %s219_s28 = sshll.u32 %s212_s11, 4  ;;  %s1415_s15 = scalar_lea.sflag [#allocation3], %s208_s30  ;;  %s1409_s28 = int_to_ptr.vmem [resolvable:$true] %s219_s28 }
  0x49   : > { %s1128_s17 = scalar_lea.hbm %s1407_s10, 2048  ;;  %p1130_p0 = pneg %p1411_p11 }
  0x4a   : > { %p1129_p12 = scmp.ne.s32.totalorder %s1407_s10, %s1128_s17  ;;  %s1133_s6 = scalar_lea.hbm %s1628_s0, 4096 }
  0x4b   : > { %p1134_p13 = scmp.lt.u32.totalorder %s1407_s10, %s1628_s0  ;;  %p1135_p6 = scmp.lt.u32.totalorder %s1133_s6, %s1128_s17 }
  0x4c   : > { %p1131_p2 = pnand %p1130_p0, %p1129_p12  ;;  %p1137_p3 = scmp.lt.u32.totalorder %s1128_s17, %s1407_s10 }
  0x4d   : > { %p1136_p10 = por %p1135_p6, %p1134_p13 }
  0x4e   : > { %p1132_p1 = pneg %p1131_p2 }
  0x4f   : > { %p1138_p5 = por %p1137_p3, %p1136_p10 }
  0x51   : > { %p1139_p9 = pnand %p1138_p5, %p1132_p1 }
  0x53   : > { %1142 = shalt.err (!%p1139_p9)
}
  0x54   : > { %s1143_s30 = scalar_lea.vmem %s1409_s28, 2048  ;;  %s1236_s11 = smov [#allocation2]  }
  0x55   : > { %p1144_p12 = scmp.ne.s32.totalorder %s1409_s28, %s1143_s30  ;;  %s1148_s23 = sshll.u32 %s1236_s11, 4  ;;  %s1149_s23 = int_to_ptr.vmem [resolvable:$false] %s1148_s23 }
  0x56   : > { %s1150_s7 = scalar_lea.vmem %s1149_s23, 4096  ;;  %p1151_p4 = scmp.lt.s32.totalorder %s1409_s28, %s1149_s23 }
  0x57   : > { %p1146_p2 = pnand %p1144_p12, %p1130_p0  ;;  %p1152_p13 = scmp.lt.s32.totalorder %s1150_s7, %s1143_s30 }
  0x59   : > { %p1147_p7 = pneg %p1146_p2  ;;  %p1153_p6 = por %p1152_p13, %p1151_p4 }
  0x5b   : > { %p1154_p10 = pnand %p1153_p6, %p1147_p7 }
  0x5d   : > { %1157 = shalt.err (!%p1154_p10)
}
  0x5e   : > { %1020 = dma.hbm_to_vmem [thread:$0]  (!%p1411_p11), %s1407_s10, 2048, %s1409_s28, %s1415_s15, %s1234_s12, %s1234_s12, %s1235_s13  }
  0x5f   : > { %231 = sbr.rel (%p1311_p8) target bundleno = 651 (0x28b), region = 40  ;;  %s1449_s17 = sand.u32 (!%p1311_p8), 1, %s1220_s19  }
  0x60   : > { %s842_s6 = sshll.u32 (!%p1311_p8), %s1449_s17, 7  ;;  %s234_s8 = scalar_lea.sflag (!%p1311_p8), [#allocation3], %s1449_s17 }
  0x61   : > { %s1455_s14 = scalar_lea.vmem (!%p1311_p8), [#allocation2], %s842_s6  ;;  %p1644_p4 = scmp.ne.s32.totalorder (!%p1311_p8), %s1637_s24, 0 }
  0x66   : > { %1203 = dma.done.wait (%p1644_p4), %s234_s8, 2048  }
  0x67   : > { %1205 = vsyncadd (%p1644_p4), %s234_s8, 4294965248  ;;  %p1645_p7 = scmp.eq.s32.totalorder %s1292_s22, 0 }
  0x69   : > { %1207 = dma.done.wait (%p1645_p7), [#allocation6], 8192   ;;  %p1646_p8 = pmov %p1645_p7 }
  0x6a   : > { %v1237_v0 = vmov 0.0   ;;  %v291_v1 = vld [vmem:[#allocation5 + $0x8] sm:$0xff]  ;;  %v293_v2 = vld [vmem:[#allocation5 + $0x18] sm:$0xff]  ;;  %v290_v3 = vld [vmem:[#allocation5] sm:$0xff]  ;;  %s1544_s10 = scalar_lea.vmem [#allocation8], %s842_s6  ;;  %s853_s28 = sshll.u32 %s1292_s22, 11 }
  0x6b   : > { %1209 = vsyncadd (%p1646_p8), [#allocation6], 4294959104  ;;  %398 = vmatprep.mubr.f32.mxu0 %v1237_v0  ;;  %v934_v4 = vpack.c.bf16 %v293_v2, %v291_v1  ;;  %v292_v5 = vld [vmem:[#allocation5 + $0x10] sm:$0xff]  ;;  %v295_v6 = vld [vmem:[#allocation5 + $0x28] sm:$0xff]  ;;  %s741_s15 = sshll.u32 %s1544_s10, 4  ;;  %s1580_s11 = scalar_lea.hbm %s1633_s5, %s853_s28  ;;  %s1582_s15 = int_to_ptr.vmem [resolvable:$true] %s741_s15 }
  0x6c   : > { %v297_v7 = vld [vmem:[#allocation5 + $0x38] sm:$0xff]  ;;  %v936_v8 = vpack.c.bf16 %v292_v5, %v290_v3  ;;  %v294_v10 = vld [vmem:[#allocation5 + $0x20] sm:$0xff]  ;;  %v296_v11 = vld [vmem:[#allocation5 + $0x30] sm:$0xff]  ;;  %s728_s23 = scalar_lea.sflag [#allocation4], %s1449_s17  ;;  %s1158_s7 = scalar_lea.vmem %s1582_s15, 2048 }
  0x6d   : > { %v938_v9 = vpack.c.bf16 %v297_v7, %v295_v6  ;;  %v299_v12 = vld [vmem:[#allocation5 + $0x48] sm:$0xff]  ;;  %935 = vmatprep.subr.bf16.mxu0 %v934_v4  ;;  %v301_v13 = vld [vmem:[#allocation5 + $0x58] sm:$0xff]  ;;  %v940_v14 = vpack.c.bf16 %v296_v11, %v294_v10  ;;  %v298_v16 = vld [vmem:[#allocation5 + $0x40] sm:$0xff]  ;;  %p1159_p11 = scmp.ne.s32.totalorder %s1582_s15, %s1158_s7  ;;  %p1647_p0 = scmp.ne.s32.totalorder %s1642_s29, 0 }
  0x6e   : > { %937 = vmatpush1.bf16.msra.mxu0 %v936_v8  ;;  %v942_v15 = vpack.c.bf16 %v301_v13, %v299_v12  ;;  %v300_v17 = vld [vmem:[#allocation5 + $0x50] sm:$0xff]  ;;  %v303_v18 = vld [vmem:[#allocation5 + $0x68] sm:$0xff]  ;;  %v305_v19 = vld [vmem:[#allocation5 + $0x78] sm:$0xff]  ;;  %s1238_s22 = smov [#allocation8]  }
  0x6f   : > { %939 = vmatprep.subr.bf16.mxu0 %v938_v9  ;;  %v944_v20 = vpack.c.bf16 %v300_v17, %v298_v16  ;;  %v946_v21 = vpack.c.bf16 %v305_v19, %v303_v18  ;;  %v302_v22 = vld [vmem:[#allocation5 + $0x60] sm:$0xff]  ;;  %v304_v23 = vld [vmem:[#allocation5 + $0x70] sm:$0xff]  ;;  %v307_v24 = vld [vmem:[#allocation5 + $0x88] sm:$0xff]  ;;  %p1160_p1 = pnand %p1159_p11, %p1647_p0  ;;  %s1162_s6 = sshll.u32 %s1238_s22, 4  ;;  %s1163_s6 = int_to_ptr.vmem [resolvable:$false] %s1162_s6 }
  0x70   : > { %v309_v25 = vld [vmem:[#allocation5 + $0x98] sm:$0xff]  ;;  %v948_v26 = vpack.c.bf16 %v304_v23, %v302_v22  ;;  %v306_v28 = vld [vmem:[#allocation5 + $0x80] sm:$0xff]  ;;  %v308_v29 = vld [vmem:[#allocation5 + $0x90] sm:$0xff]  ;;  %s1164_s8 = scalar_lea.vmem %s1163_s6, 4096  ;;  %p1165_p5 = scmp.lt.s32.totalorder %s1582_s15, %s1163_s6 }
  0x71   : > { %v950_v27 = vpack.c.bf16 %v309_v25, %v307_v24  ;;  %v311_v30 = vld [vmem:[#allocation5 + $0xa8] sm:$0xff]  ;;  %v313_v31 = vld [vmem:[#allocation5 + $0xb8] sm:$0xff]  ;;  %v310_v32 = vld [vmem:[#allocation5 + $0xa0] sm:$0xff]  ;;  %v952_v34 = vpack.c.bf16 %v308_v29, %v306_v28  ;;  %p1161_p3 = pneg %p1160_p1  ;;  %p1166_p9 = scmp.lt.s32.totalorder %s1164_s8, %s1158_s7 }
  0x72   : > { %941 = vmatpush1.bf16.msra.mxu0 %v940_v14  ;;  %v312_v33 = vld [vmem:[#allocation5 + $0xb0] sm:$0xff]  ;;  %v315_v35 = vld [vmem:[#allocation5 + $0xc8] sm:$0xff]  ;;  %v317_v36 = vld [vmem:[#allocation5 + $0xd8] sm:$0xff]  ;;  %v954_v40 = vpack.c.bf16 %v313_v31, %v311_v30 }
  0x73   : > { %943 = vmatprep.subr.bf16.mxu0 %v942_v15  ;;  %v543_v37 = vld [vmem:[#allocation7 + $0x80] sm:$0xff]  ;;  %v544_v38 = vld [vmem:[#allocation7 + $0x88] sm:$0xff]  ;;  %v545_v43 = vld [vmem:[#allocation7 + $0x90] sm:$0xff]  ;;  %v956_v51 = vpack.c.bf16 %v312_v33, %v310_v32  ;;  %v958_v55 = vpack.c.bf16 %v317_v36, %v315_v35  ;;  %p1167_p12 = por %p1166_p9, %p1165_p5 }
  0x74   : > { %v527_v39 = vld [vmem:[#allocation7] sm:$0xff]  ;;  %v966_v41 = vpack.c.bf16 %v544_v38, %v543_v37  ;;  %v528_v42 = vld [vmem:[#allocation7 + $0x8] sm:$0xff]  ;;  %v546_v44 = vld [vmem:[#allocation7 + $0x98] sm:$0xff] }
  0x75   : > { %v968_v45 = vpack.c.bf16 %v528_v42, %v527_v39  ;;  %v970_v46 = vpack.c.bf16 %v546_v44, %v545_v43  ;;  %v529_v47 = vld [vmem:[#allocation7 + $0x10] sm:$0xff]  ;;  %v530_v48 = vld [vmem:[#allocation7 + $0x18] sm:$0xff]  ;;  %v547_v49 = vld [vmem:[#allocation7 + $0xa0] sm:$0xff]  ;;  %p1168_p2 = pnand %p1167_p12, %p1161_p3 }
  0x76   : > { %945 = vmatpush1.bf16.msra.mxu0 %v944_v20  ;;  %967 = vmatprep.subr.bf16.mxu1 %v966_v41  ;;  %v548_v50 = vld [vmem:[#allocation7 + $0xa8] sm:$0xff]  ;;  %v314_v52 = vld [vmem:[#allocation5 + $0xc0] sm:$0xff]  ;;  %v316_v53 = vld [vmem:[#allocation5 + $0xd0] sm:$0xff]  ;;  %v972_v54 = vpack.c.bf16 %v530_v48, %v529_v47 }
  0x77   : > { %947 = vmatprep.subr.bf16.mxu0 %v946_v21  ;;  %969 = vmatpush3.bf16.msra.mxu1 %v968_v45  ;;  %v319_v56 = vld [vmem:[#allocation5 + $0xe8] sm:$0xff]  ;;  %v974_v57 = vpack.c.bf16 %v548_v50, %v547_v49  ;;  %v531_v58 = vld [vmem:[#allocation7 + $0x20] sm:$0xff]  ;;  %v321_v60 = vld [vmem:[#allocation5 + $0xf8] sm:$0xff]  ;;  %v960_v63 = vpack.c.bf16 %v316_v53, %v314_v52  ;;  %v324_v50 = vlaneseq }
  0x78   : > { %971 = vmatprep.subr.bf16.mxu1 %v970_v46  ;;  %v532_v59 = vld [vmem:[#allocation7 + $0x28] sm:$0xff]  ;;  %v549_v61 = vld [vmem:[#allocation7 + $0xb0] sm:$0xff]  ;;  %v550_v62 = vld [vmem:[#allocation7 + $0xb8] sm:$0xff]  ;;  %v962_v3 = vpack.c.bf16 %v321_v60, %v319_v56 }
  0x79   : > { %v318_v1 = vld [vmem:[#allocation5 + $0xe0] sm:$0xff]  ;;  %v976_v2 = vpack.c.bf16 %v532_v59, %v531_v58  ;;  %v320_v4 = vld [vmem:[#allocation5 + $0xf0] sm:$0xff]  ;;  %v978_v5 = vpack.c.bf16 %v550_v62, %v549_v61  ;;  %v534_v7 = vld [vmem:[#allocation7 + $0x38] sm:$0xff] }
  0x7a   : > { %949 = vmatpush1.bf16.msra.mxu0 %v948_v26  ;;  %v533_v6 = vld [vmem:[#allocation7 + $0x30] sm:$0xff]  ;;  %v551_v8 = vld [vmem:[#allocation7 + $0xc0] sm:$0xff]  ;;  %v552_v9 = vld [vmem:[#allocation7 + $0xc8] sm:$0xff]  ;;  %v964_v10 = vpack.c.bf16 %v320_v4, %v318_v1 }
  0x7b   : > { %951 = vmatprep.subr.bf16.mxu0 %v950_v27  ;;  %973 = vmatpush3.bf16.msra.mxu1 %v972_v54  ;;  %v980_v11 = vpack.c.bf16 %v534_v7, %v533_v6  ;;  %v982_v12 = vpack.c.bf16 %v552_v9, %v551_v8  ;;  %v535_v13 = vld [vmem:[#allocation7 + $0x40] sm:$0xff]  ;;  %v536_v14 = vld [vmem:[#allocation7 + $0x48] sm:$0xff]  ;;  %v553_v15 = vld [vmem:[#allocation7 + $0xd0] sm:$0xff] }
  0x7c   : > { %975 = vmatprep.subr.bf16.mxu1 %v974_v57  ;;  %v554_v16 = vld [vmem:[#allocation7 + $0xd8] sm:$0xff]  ;;  %v274_v17 = vld [vmem:[%s1455_s14] sm:$0xff]  ;;  %v984_v18 = vpack.c.bf16 %v536_v14, %v535_v13  ;;  %v537_v20 = vld [vmem:[#allocation7 + $0x50] sm:$0xff] }
  0x7d   : > { %v986_v19 = vpack.c.bf16 %v554_v16, %v553_v15  ;;  %v538_v21 = vld [vmem:[#allocation7 + $0x58] sm:$0xff]  ;;  %v555_v22 = vld [vmem:[#allocation7 + $0xe0] sm:$0xff]  ;;  %v556_v23 = vld [vmem:[#allocation7 + $0xe8] sm:$0xff] }
  0x7e   : > { %953 = vmatpush1.bf16.msra.mxu0 %v952_v34  ;;  %v275_v24 = vld [vmem:[%s1455_s14 + $0x8] sm:$0xff]  ;;  %v988_v25 = vpack.c.bf16 %v538_v21, %v537_v20  ;;  %v990_v26 = vpack.c.bf16 %v556_v23, %v555_v22  ;;  %v276_v27 = vld [vmem:[%s1455_s14 + $0x10] sm:$0xff]  ;;  %v277_v28 = vld [vmem:[%s1455_s14 + $0x18] sm:$0xff] }
  0x7f   : > { %955 = vmatprep.subr.bf16.mxu0 %v954_v40  ;;  %977 = vmatpush3.bf16.msra.mxu1 %v976_v2  ;;  %v278_v29 = vld [vmem:[%s1455_s14 + $0x20] sm:$0xff]  ;;  %v279_v30 = vld [vmem:[%s1455_s14 + $0x28] sm:$0xff]  ;;  %v280_v31 = vld [vmem:[%s1455_s14 + $0x30] sm:$0xff] }
  0x80   : > { %979 = vmatprep.subr.bf16.mxu1 %v978_v5  ;;  %v281_v32 = vld [vmem:[%s1455_s14 + $0x38] sm:$0xff]  ;;  %v282_v33 = vld [vmem:[%s1455_s14 + $0x40] sm:$0xff]  ;;  %v283_v34 = vld [vmem:[%s1455_s14 + $0x48] sm:$0xff] }
  0x81   : > { %v284_v35 = vld [vmem:[%s1455_s14 + $0x50] sm:$0xff]  ;;  %v285_v36 = vld [vmem:[%s1455_s14 + $0x58] sm:$0xff]  ;;  %v286_v37 = vld [vmem:[%s1455_s14 + $0x60] sm:$0xff] }
  0x82   : > { %957 = vmatpush1.bf16.msra.mxu0 %v956_v51  ;;  %v287_v38 = vld [vmem:[%s1455_s14 + $0x68] sm:$0xff]  ;;  %v288_v39 = vld [vmem:[%s1455_s14 + $0x70] sm:$0xff]  ;;  %v289_v40 = vld [vmem:[%s1455_s14 + $0x78] sm:$0xff]  ;;  %v325_v51 = vshrl.u32 %v324_v50, 7 }
  0x83   : > { %959 = vmatprep.subr.bf16.mxu0 %v958_v55  ;;  %981 = vmatpush3.bf16.msra.mxu1 %v980_v11  ;;  %v539_v41 = vld [vmem:[#allocation7 + $0x60] sm:$0xff]  ;;  %v540_v42 = vld [vmem:[#allocation7 + $0x68] sm:$0xff]  ;;  %v557_v44 = vld [vmem:[#allocation7 + $0xf0] sm:$0xff] }
  0x84   : > { %983 = vmatprep.subr.bf16.mxu1 %v982_v12  ;;  %v992_v43 = vpack.c.bf16 %v540_v42, %v539_v41  ;;  %v558_v45 = vld [vmem:[#allocation7 + $0xf8] sm:$0xff]  ;;  %v541_v47 = vld [vmem:[#allocation7 + $0x70] sm:$0xff]  ;;  %v326_v52 = vsub.s32 0, %v325_v51  ;;  %v330_v53 = vsub.s32 1, %v325_v51 }
  0x85   : > { %v994_v46 = vpack.c.bf16 %v558_v45, %v557_v44  ;;  %v542_v48 = vld [vmem:[#allocation7 + $0x78] sm:$0xff] }
  0x86   : > { %961 = vmatpush1.bf16.msra.mxu0 %v960_v63  ;;  %v996_v49 = vpack.c.bf16 %v542_v48, %v541_v47 }
  0x87   : > { %963 = vmatprep.subr.bf16.mxu0 %v962_v3  ;;  %985 = vmatpush3.bf16.msra.mxu1 %v984_v18 }
  0x88   : > { %987 = vmatprep.subr.bf16.mxu1 %v986_v19 }
  0x8a   : > { %965 = vmatpush1.bf16.msra.mxu0 %v964_v10 }
  0x8b   : > { %989 = vmatpush3.bf16.msra.mxu1 %v988_v25 }
  0x8c   : > { %991 = vmatprep.subr.bf16.mxu1 %v990_v26 }
  0x8d   : > { %399 = vmatmul.mubr.f32.vlgmr.msra.gmra.mrb[0].mxu0 %v274_v17 }
  0x8e   : > { %404 = vmatprep.mubr.f32.mxu0 %v1237_v0 }
  0x8f   : > { %993 = vmatpush3.bf16.msra.mxu1 %v992_v43 }
  0x90   : > { %995 = vmatprep.subr.bf16.mxu1 %v994_v46 }
  0x91   : > { %405 = vmatmul.mubr.f32.gmra.mrb[2].mxu0 %v275_v24 }
  0x92   : > { %410 = vmatprep.mubr.f32.mxu0 %v1237_v0 }
  0x93   : > { %997 = vmatpush3.bf16.msra.mxu1 %v996_v49 }
  0x95   : > { %411 = vmatmul.mubr.f32.gmra.mrb[4].mxu0 %v276_v27 }
  0x96   : > { %416 = vmatprep.mubr.f32.mxu0 %v1237_v0 }
  0x99   : > { %417 = vmatmul.mubr.f32.gmra.mrb[6].mxu0 %v277_v28 }
  0x9a   : > { %422 = vmatprep.mubr.f32.mxu0 %v1237_v0 }
  0x9d   : > { %423 = vmatmul.mubr.f32.gmra.mrb[8].mxu0 %v278_v29 }
  0x9e   : > { %428 = vmatprep.mubr.f32.mxu0 %v1237_v0 }
  0xa1   : > { %429 = vmatmul.mubr.f32.gmra.mrb[10].mxu0 %v279_v30 }
  0xa2   : > { %434 = vmatprep.mubr.f32.mxu0 %v1237_v0 }
  0xa5   : > { %435 = vmatmul.mubr.f32.gmra.mrb[12].mxu0 %v280_v31 }
  0xa6   : > { %440 = vmatprep.mubr.f32.mxu0 %v1237_v0 }
  0xa9   : > { %441 = vmatmul.mubr.f32.gmra.mrb[14].mxu0 %v281_v32 }
  0xaa   : > { %446 = vmatprep.mubr.f32.mxu0 %v1237_v0 }
  0xad   : > { %447 = vmatmul.mubr.f32.gmra.mrb[16].mxu0 %v282_v33 }
  0xae   : > { %452 = vmatprep.mubr.f32.mxu0 %v1237_v0 }
  0xb1   : > { %453 = vmatmul.mubr.f32.gmra.mrb[18].mxu0 %v283_v34 }
  0xb2   : > { %458 = vmatprep.mubr.f32.mxu0 %v1237_v0 }
  0xb5   : > { %459 = vmatmul.mubr.f32.gmra.mrb[20].mxu0 %v284_v35 }
  0xb6   : > { %464 = vmatprep.mubr.f32.mxu0 %v1237_v0 }
  0xb9   : > { %465 = vmatmul.mubr.f32.gmra.mrb[22].mxu0 %v285_v36 }
  0xba   : > { %470 = vmatprep.mubr.f32.mxu0 %v1237_v0 }
  0xbd   : > { %471 = vmatmul.mubr.f32.gmra.mrb[24].mxu0 %v286_v37 }
  0xbe   : > { %476 = vmatprep.mubr.f32.mxu0 %v1237_v0 }
  0xc1   : > { %477 = vmatmul.mubr.f32.gmra.mrb[26].mxu0 %v287_v38 }
  0xc2   : > { %482 = vmatprep.mubr.f32.mxu0 %v1237_v0 }
  0xc5   : > { %483 = vmatmul.mubr.f32.gmra.mrb[28].mxu0 %v288_v39 }
  0xc6   : > { %488 = vmatprep.mubr.f32.mxu0 %v1237_v0  ;;  %v322_v0 = vld [vmem:[%s1630_s2] sm:$0x3] }
  0xc7   : > { %v1500_v54 = vrot.slane %v322_v0, %v326_v52  ;;  %v1502_v55 = vrot.slane %v322_v0, %v330_v53 }
  0xc9   : > { %489 = vmatmul.mubr.f32.gmra.mrb[30].mxu0 %v289_v40 }
 0x160   : > { %v400_v56 = vpop.f32.mrb[0].mxu0 }
 0x161   : > { %v401_v57 = vadd.f32 %v400_v56, %v1500_v54  ;;  %v402_v58 = vpop.f32.mrb[1].mxu0 }
 0x162   : > { %v403_v59 = vadd.f32 %v402_v58, %v1502_v55 }
 0x163   : > { %v495_v62 = vmax.f32 %v401_v57, 0.0 }
 0x164   : > { %v406_v60 = vpop.f32.mrb[2].mxu0  ;;  %v496_v61 = vmax.f32 %v403_v59, 0.0 }
 0x165   : > { %v407_v63 = vadd.f32 %v406_v60, %v1500_v54  ;;  %v408_v1 = vpop.f32.mrb[3].mxu0 }
 0x166   : > { %v409_v2 = vadd.f32 %v408_v1, %v1502_v55  ;;  %630 = vmatprep.mubr.f32.mxu1 %v496_v61 }
 0x167   : > { %631 = vmatmul.mubr.f32.vlgmr.msra.gmra.mrb[0].mxu1 %v495_v62  ;;  %v497_v5 = vmax.f32 %v407_v63, 0.0 }
 0x168   : > { %v498_v3 = vmax.f32 %v409_v2, 0.0  ;;  %v412_v4 = vpop.f32.mrb[4].mxu0 }
 0x169   : > { %v413_v6 = vadd.f32 %v412_v4, %v1500_v54  ;;  %v414_v7 = vpop.f32.mrb[5].mxu0 }
 0x16a   : > { %v415_v8 = vadd.f32 %v414_v7, %v1502_v55  ;;  %635 = vmatprep.mubr.f32.mxu1 %v498_v3 }
 0x16b   : > { %636 = vmatmul.mubr.f32.gmra.mrb[2].mxu1 %v497_v5  ;;  %v499_v11 = vmax.f32 %v413_v6, 0.0 }
 0x16c   : > { %v500_v9 = vmax.f32 %v415_v8, 0.0  ;;  %v418_v10 = vpop.f32.mrb[6].mxu0 }
 0x16d   : > { %v419_v12 = vadd.f32 %v418_v10, %v1500_v54  ;;  %v420_v13 = vpop.f32.mrb[7].mxu0 }
 0x16e   : > { %v421_v14 = vadd.f32 %v420_v13, %v1502_v55  ;;  %640 = vmatprep.mubr.f32.mxu1 %v500_v9 }
 0x16f   : > { %641 = vmatmul.mubr.f32.gmra.mrb[4].mxu1 %v499_v11  ;;  %v501_v17 = vmax.f32 %v419_v12, 0.0 }
 0x170   : > { %v502_v15 = vmax.f32 %v421_v14, 0.0  ;;  %v424_v16 = vpop.f32.mrb[8].mxu0 }
 0x171   : > { %v425_v18 = vadd.f32 %v424_v16, %v1500_v54  ;;  %v426_v19 = vpop.f32.mrb[9].mxu0 }
 0x172   : > { %v427_v20 = vadd.f32 %v426_v19, %v1502_v55  ;;  %645 = vmatprep.mubr.f32.mxu1 %v502_v15 }
 0x173   : > { %646 = vmatmul.mubr.f32.gmra.mrb[6].mxu1 %v501_v17  ;;  %v503_v23 = vmax.f32 %v425_v18, 0.0 }
 0x174   : > { %v504_v21 = vmax.f32 %v427_v20, 0.0  ;;  %v430_v22 = vpop.f32.mrb[10].mxu0 }
 0x175   : > { %v431_v24 = vadd.f32 %v430_v22, %v1500_v54  ;;  %v432_v25 = vpop.f32.mrb[11].mxu0 }
 0x176   : > { %v433_v26 = vadd.f32 %v432_v25, %v1502_v55  ;;  %650 = vmatprep.mubr.f32.mxu1 %v504_v21 }
 0x177   : > { %651 = vmatmul.mubr.f32.gmra.mrb[8].mxu1 %v503_v23  ;;  %v505_v29 = vmax.f32 %v431_v24, 0.0 }
 0x178   : > { %v506_v27 = vmax.f32 %v433_v26, 0.0  ;;  %v436_v28 = vpop.f32.mrb[12].mxu0 }
 0x179   : > { %v437_v30 = vadd.f32 %v436_v28, %v1500_v54  ;;  %v438_v31 = vpop.f32.mrb[13].mxu0  ;;  %v1539_v28 = vld [vmem:[%s1632_s4] ss:$0 sm:$0xff] }
 0x17a   : > { %v439_v32 = vadd.f32 %v438_v31, %v1502_v55  ;;  %655 = vmatprep.mubr.f32.mxu1 %v506_v27 }
 0x17b   : > { %656 = vmatmul.mubr.f32.gmra.mrb[10].mxu1 %v505_v29  ;;  %v507_v35 = vmax.f32 %v437_v30, 0.0 }
 0x17c   : > { %v508_v33 = vmax.f32 %v439_v32, 0.0  ;;  %v442_v34 = vpop.f32.mrb[14].mxu0 }
 0x17d   : > { %v443_v36 = vadd.f32 %v442_v34, %v1500_v54  ;;  %v444_v37 = vpop.f32.mrb[15].mxu0 }
 0x17e   : > { %v445_v38 = vadd.f32 %v444_v37, %v1502_v55  ;;  %660 = vmatprep.mubr.f32.mxu1 %v508_v33 }
 0x17f   : > { %661 = vmatmul.mubr.f32.gmra.mrb[12].mxu1 %v507_v35  ;;  %v509_v41 = vmax.f32 %v443_v36, 0.0 }
 0x180   : > { %v510_v39 = vmax.f32 %v445_v38, 0.0  ;;  %v448_v40 = vpop.f32.mrb[16].mxu0 }
 0x181   : > { %v449_v42 = vadd.f32 %v448_v40, %v1500_v54  ;;  %v450_v43 = vpop.f32.mrb[17].mxu0 }
 0x182   : > { %v451_v44 = vadd.f32 %v450_v43, %v1502_v55  ;;  %665 = vmatprep.mubr.f32.mxu1 %v510_v39 }
 0x183   : > { %666 = vmatmul.mubr.f32.gmra.mrb[14].mxu1 %v509_v41  ;;  %v511_v47 = vmax.f32 %v449_v42, 0.0 }
 0x184   : > { %v512_v45 = vmax.f32 %v451_v44, 0.0  ;;  %v454_v46 = vpop.f32.mrb[18].mxu0 }
 0x185   : > { %v455_v48 = vadd.f32 %v454_v46, %v1500_v54  ;;  %v456_v49 = vpop.f32.mrb[19].mxu0 }
 0x186   : > { %v457_v50 = vadd.f32 %v456_v49, %v1502_v55  ;;  %670 = vmatprep.mubr.f32.mxu1 %v512_v45 }
 0x187   : > { %671 = vmatmul.mubr.f32.gmra.mrb[16].mxu1 %v511_v47  ;;  %v513_v0 = vmax.f32 %v455_v48, 0.0 }
 0x188   : > { %v514_v51 = vmax.f32 %v457_v50, 0.0  ;;  %v460_v52 = vpop.f32.mrb[20].mxu0 }
 0x189   : > { %v461_v53 = vadd.f32 %v460_v52, %v1500_v54  ;;  %v462_v56 = vpop.f32.mrb[21].mxu0 }
 0x18a   : > { %v463_v57 = vadd.f32 %v462_v56, %v1502_v55  ;;  %675 = vmatprep.mubr.f32.mxu1 %v514_v51 }
 0x18b   : > { %676 = vmatmul.mubr.f32.gmra.mrb[18].mxu1 %v513_v0  ;;  %v515_v60 = vmax.f32 %v461_v53, 0.0 }
 0x18c   : > { %v516_v58 = vmax.f32 %v463_v57, 0.0  ;;  %v466_v59 = vpop.f32.mrb[22].mxu0 }
 0x18d   : > { %v467_v61 = vadd.f32 %v466_v59, %v1500_v54  ;;  %v468_v62 = vpop.f32.mrb[23].mxu0 }
 0x18e   : > { %v469_v63 = vadd.f32 %v468_v62, %v1502_v55  ;;  %680 = vmatprep.mubr.f32.mxu1 %v516_v58 }
 0x18f   : > { %681 = vmatmul.mubr.f32.gmra.mrb[20].mxu1 %v515_v60  ;;  %v517_v3 = vmax.f32 %v467_v61, 0.0 }
 0x190   : > { %v518_v1 = vmax.f32 %v469_v63, 0.0  ;;  %v472_v2 = vpop.f32.mrb[24].mxu0 }
 0x191   : > { %v473_v4 = vadd.f32 %v472_v2, %v1500_v54  ;;  %v474_v5 = vpop.f32.mrb[25].mxu0 }
 0x192   : > { %v475_v6 = vadd.f32 %v474_v5, %v1502_v55  ;;  %685 = vmatprep.mubr.f32.mxu1 %v518_v1 }
 0x193   : > { %686 = vmatmul.mubr.f32.gmra.mrb[22].mxu1 %v517_v3  ;;  %v519_v9 = vmax.f32 %v473_v4, 0.0 }
 0x194   : > { %v520_v7 = vmax.f32 %v475_v6, 0.0  ;;  %v478_v8 = vpop.f32.mrb[26].mxu0 }
 0x195   : > { %v479_v10 = vadd.f32 %v478_v8, %v1500_v54  ;;  %v480_v11 = vpop.f32.mrb[27].mxu0 }
 0x196   : > { %v481_v12 = vadd.f32 %v480_v11, %v1502_v55  ;;  %690 = vmatprep.mubr.f32.mxu1 %v520_v7 }
 0x197   : > { %691 = vmatmul.mubr.f32.gmra.mrb[24].mxu1 %v519_v9  ;;  %v521_v15 = vmax.f32 %v479_v10, 0.0 }
 0x198   : > { %v522_v13 = vmax.f32 %v481_v12, 0.0  ;;  %v484_v14 = vpop.f32.mrb[28].mxu0 }
 0x199   : > { %v485_v16 = vadd.f32 %v484_v14, %v1500_v54  ;;  %v486_v17 = vpop.f32.mrb[29].mxu0 }
 0x19a   : > { %v487_v18 = vadd.f32 %v486_v17, %v1502_v55  ;;  %695 = vmatprep.mubr.f32.mxu1 %v522_v13 }
 0x19b   : > { %696 = vmatmul.mubr.f32.gmra.mrb[26].mxu1 %v521_v15  ;;  %v523_v21 = vmax.f32 %v485_v16, 0.0 }
 0x19c   : > { %v524_v19 = vmax.f32 %v487_v18, 0.0  ;;  %v490_v20 = vpop.f32.mrb[30].mxu0 }
 0x19d   : > { %v491_v22 = vadd.f32 %v490_v20, %v1500_v54  ;;  %v492_v23 = vpop.f32.mrb[31].mxu0 }
 0x19e   : > { %v493_v24 = vadd.f32 %v492_v23, %v1502_v55  ;;  %700 = vmatprep.mubr.f32.mxu1 %v524_v19 }
 0x19f   : > { %701 = vmatmul.mubr.f32.gmra.mrb[28].mxu1 %v523_v21  ;;  %v525_v26 = vmax.f32 %v491_v22, 0.0 }
 0x1a0   : > { %v526_v25 = vmax.f32 %v493_v24, 0.0 }
 0x1a2   : > { %705 = vmatprep.mubr.f32.mxu1 %v526_v25 }
 0x1a3   : > { %706 = vmatmul.mubr.f32.gmra.mrb[30].mxu1 %v525_v26 }
 0x23a   : > { %v886_v27 = vpop.f32.mrb[0].mxu1 }
 0x23b   : > { %v887_v29 = vpop.f32.mrb[1].mxu1 }
 0x23c   : > { %v888_v30 = vadd.f32 %v887_v29, %v886_v27 }
 0x23e   : > { %v633_v54 = vadd.f32 %v888_v30, %v1539_v28  ;;  %v889_v31 = vpop.f32.mrb[2].mxu1 }
 0x23f   : > { %v890_v32 = vpop.f32.mrb[3].mxu1 }
 0x240   : > { %711 = vst [vmem:[%s1544_s10] sm:$0xff] %v633_v54  ;;  %v891_v55 = vadd.f32 %v890_v32, %v889_v31 }
 0x242   : > { %v638_v33 = vadd.f32 %v891_v55, %v1539_v28  ;;  %v892_v34 = vpop.f32.mrb[4].mxu1 }
 0x243   : > { %v893_v35 = vpop.f32.mrb[5].mxu1 }
 0x244   : > { %712 = vst [vmem:[%s1544_s10 + $0x8] sm:$0xff] %v638_v33  ;;  %v894_v36 = vadd.f32 %v893_v35, %v892_v34 }
 0x246   : > { %v643_v37 = vadd.f32 %v894_v36, %v1539_v28  ;;  %v895_v38 = vpop.f32.mrb[6].mxu1 }
 0x247   : > { %v896_v39 = vpop.f32.mrb[7].mxu1 }
 0x248   : > { %713 = vst [vmem:[%s1544_s10 + $0x10] sm:$0xff] %v643_v37  ;;  %v897_v40 = vadd.f32 %v896_v39, %v895_v38 }
 0x24a   : > { %v648_v41 = vadd.f32 %v897_v40, %v1539_v28  ;;  %v898_v42 = vpop.f32.mrb[8].mxu1 }
 0x24b   : > { %v899_v43 = vpop.f32.mrb[9].mxu1 }
 0x24c   : > { %714 = vst [vmem:[%s1544_s10 + $0x18] sm:$0xff] %v648_v41  ;;  %v900_v44 = vadd.f32 %v899_v43, %v898_v42 }
 0x24e   : > { %v653_v45 = vadd.f32 %v900_v44, %v1539_v28  ;;  %v901_v46 = vpop.f32.mrb[10].mxu1 }
 0x24f   : > { %v902_v47 = vpop.f32.mrb[11].mxu1 }
 0x250   : > { %715 = vst [vmem:[%s1544_s10 + $0x20] sm:$0xff] %v653_v45  ;;  %v903_v48 = vadd.f32 %v902_v47, %v901_v46 }
 0x252   : > { %v658_v49 = vadd.f32 %v903_v48, %v1539_v28  ;;  %v904_v50 = vpop.f32.mrb[12].mxu1 }
 0x253   : > { %v905_v51 = vpop.f32.mrb[13].mxu1 }
 0x254   : > { %716 = vst [vmem:[%s1544_s10 + $0x28] sm:$0xff] %v658_v49  ;;  %v906_v52 = vadd.f32 %v905_v51, %v904_v50 }
 0x256   : > { %v663_v0 = vadd.f32 %v906_v52, %v1539_v28  ;;  %v907_v53 = vpop.f32.mrb[14].mxu1 }
 0x257   : > { %v908_v56 = vpop.f32.mrb[15].mxu1 }
 0x258   : > { %717 = vst [vmem:[%s1544_s10 + $0x30] sm:$0xff] %v663_v0  ;;  %v909_v57 = vadd.f32 %v908_v56, %v907_v53 }
 0x25a   : > { %v668_v58 = vadd.f32 %v909_v57, %v1539_v28  ;;  %v910_v59 = vpop.f32.mrb[16].mxu1 }
 0x25b   : > { %v911_v60 = vpop.f32.mrb[17].mxu1 }
 0x25c   : > { %718 = vst [vmem:[%s1544_s10 + $0x38] sm:$0xff] %v668_v58  ;;  %v912_v61 = vadd.f32 %v911_v60, %v910_v59 }
 0x25e   : > { %v673_v62 = vadd.f32 %v912_v61, %v1539_v28  ;;  %v913_v63 = vpop.f32.mrb[18].mxu1 }
 0x25f   : > { %v914_v1 = vpop.f32.mrb[19].mxu1 }
 0x260   : > { %719 = vst [vmem:[%s1544_s10 + $0x40] sm:$0xff] %v673_v62  ;;  %v915_v2 = vadd.f32 %v914_v1, %v913_v63 }
 0x262   : > { %v678_v3 = vadd.f32 %v915_v2, %v1539_v28  ;;  %v916_v4 = vpop.f32.mrb[20].mxu1 }
 0x263   : > { %v917_v5 = vpop.f32.mrb[21].mxu1 }
 0x264   : > { %720 = vst [vmem:[%s1544_s10 + $0x48] sm:$0xff] %v678_v3  ;;  %v918_v6 = vadd.f32 %v917_v5, %v916_v4 }
 0x266   : > { %v683_v7 = vadd.f32 %v918_v6, %v1539_v28  ;;  %v919_v8 = vpop.f32.mrb[22].mxu1 }
 0x267   : > { %v920_v9 = vpop.f32.mrb[23].mxu1 }
 0x268   : > { %721 = vst [vmem:[%s1544_s10 + $0x50] sm:$0xff] %v683_v7  ;;  %v921_v10 = vadd.f32 %v920_v9, %v919_v8 }
 0x26a   : > { %v688_v11 = vadd.f32 %v921_v10, %v1539_v28  ;;  %v922_v12 = vpop.f32.mrb[24].mxu1 }
 0x26b   : > { %v923_v13 = vpop.f32.mrb[25].mxu1 }
 0x26c   : > { %722 = vst [vmem:[%s1544_s10 + $0x58] sm:$0xff] %v688_v11  ;;  %v924_v14 = vadd.f32 %v923_v13, %v922_v12 }
 0x26e   : > { %v693_v15 = vadd.f32 %v924_v14, %v1539_v28  ;;  %v925_v16 = vpop.f32.mrb[26].mxu1 }
 0x26f   : > { %v926_v17 = vpop.f32.mrb[27].mxu1 }
 0x270   : > { %723 = vst [vmem:[%s1544_s10 + $0x60] sm:$0xff] %v693_v15  ;;  %v927_v18 = vadd.f32 %v926_v17, %v925_v16 }
 0x272   : > { %v698_v19 = vadd.f32 %v927_v18, %v1539_v28  ;;  %v928_v20 = vpop.f32.mrb[28].mxu1 }
 0x273   : > { %v929_v21 = vpop.f32.mrb[29].mxu1 }
 0x274   : > { %724 = vst [vmem:[%s1544_s10 + $0x68] sm:$0xff] %v698_v19  ;;  %v930_v22 = vadd.f32 %v929_v21, %v928_v20 }
 0x276   : > { %v703_v23 = vadd.f32 %v930_v22, %v1539_v28  ;;  %v931_v24 = vpop.f32.mrb[30].mxu1 }
 0x277   : > { %v932_v25 = vpop.f32.mrb[31].mxu1 }
 0x278   : > { %725 = vst [vmem:[%s1544_s10 + $0x70] sm:$0xff] %v703_v23  ;;  %v933_v26 = vadd.f32 %v932_v25, %v931_v24 }
 0x27a   : > { %v708_v27 = vadd.f32 %v933_v26, %v1539_v28 }
 0x27c   : > { %726 = vst [vmem:[%s1544_s10 + $0x78] sm:$0xff] %v708_v27 }
 0x27d   : > { %1171 = shalt.err (!%p1168_p2)
}
 0x27e   : > { %s1172_s14 = scalar_lea.hbm %s1580_s11, 2048  ;;  %s1176_s12 = scalar_lea.hbm %s1633_s5, 4096 }
 0x27f   : > { %p1173_p13 = scmp.ne.s32.totalorder %s1580_s11, %s1172_s14  ;;  %p1177_p4 = scmp.lt.u32.totalorder %s1580_s11, %s1633_s5 }
 0x280   : > { %p1178_p7 = scmp.lt.u32.totalorder %s1176_s12, %s1172_s14  ;;  %p1180_p11 = scmp.lt.u32.totalorder %s1172_s14, %s1580_s11 }
 0x281   : > { %p1174_p6 = pnand %p1173_p13, %p1647_p0 }
 0x282   : > { %p1179_p8 = por %p1178_p7, %p1177_p4 }
 0x283   : > { %p1175_p10 = pneg %p1174_p6 }
 0x284   : > { %p1181_p1 = por %p1180_p11, %p1179_p8 }
 0x286   : > { %p1182_p3 = pnand %p1181_p1, %p1175_p10 }
 0x288   : > { %1185 = shalt.err (!%p1182_p3)
}
 0x289   : > { %s1239_s28 = smov 128   ;;  %s1240_s9 = smov 8  }
 0x28a   : > { %1008 = dma.vmem_to_hbm [thread:$0]  (%p1647_p0), %s1582_s15, 2048, %s1580_s11, %s728_s23, %s1239_s28, %s1239_s28, %s1240_s9  }
 0x28b PF: > { %s756_s30 = sand.u32 1, %s1216_s18   ;;  %p1648_p5 = scmp.ne.s32.totalorder %s1638_s25, 0 }
 0x28c   : > { %p1649_p9 = scmp.ge.s32.totalorder %s1228_s21, 2  ;;  %s757_s7 = scalar_lea.sflag [#allocation4], %s756_s30 }
 0x28e   : > { %p1022_p12 = pnand %p1649_p9, %p1648_p5 }
 0x290   : > { %1211 = dma.done.wait (!%p1022_p12), %s757_s7, 2048  }
 0x291   : > { %1213 = vsyncadd (!%p1022_p12), %s757_s7, 4294965248  ;;  %p19_p2 = scmp.ge.s32.totalorder %s1384_s16, 4   ;;  %s1650_s18 = smov %s1220_s19 }
 0x292   : > { %s1651_s19 = smov %s1224_s20  ;;  %s1652_s20 = smov %s1393_s27 }
 0x293   : > { %s1653_s21 = smov %s1384_s16  ;;  %21 = sbr.rel (!%p19_p2) target bundleno = 6 (0x6), region = 93 }
 0x29a   :  { %762 = vsyncpa [#allocation3], 1 }
 0x29b   :  { %764 = vsyncpa [#allocation3 + $0x1], 1 }
 0x29c   :  { %765 = vsyncpa [#allocation6], 1 }
 0x29d   :  { %766 = vsyncpa [#allocation4], 1 }
 0x29e   :  { %768 = vsyncpa [#allocation4 + $0x1], 1 }

</bundles_post_ra>
